<compile_context>
chip_gen: v6e
topology: v6e:2x2x1
jax: 0.10.0
libtpu: 0.0.40
codegen_flags: <defaults>
</compile_context>

<pallas_src>
import functools
import math

import jax
import jax.numpy as jnp
from jax import lax
from jax.experimental import pallas as pl
from jax.experimental.pallas import tpu as pltpu

_LN_EPS = 1e-6  # timm ViT/DeiT LayerNorm eps
_INV_SQRT2 = 1.0 / math.sqrt(2.0)


# ----------------------------------------------------------------------------- helpers

def _ln(x, g, b, eps):
    """LayerNorm over last axis. x:[M,D] f32, g/b:[1,D] f32."""
    mean = jnp.mean(x, axis=-1, keepdims=True)
    xc = x - mean
    var = jnp.mean(xc * xc, axis=-1, keepdims=True)
    return xc * lax.rsqrt(var + eps) * g + b


def _gelu_exact(x):
    """erf-based GELU, matching nn.GELU() exactly (f32)."""
    return 0.5 * x * (1.0 + lax.erf(x * _INV_SQRT2))


def _full_spec(shape):
    """BlockSpec covering the whole (grid-invariant) array for a 1-D grid."""
    zeros = (0,) * len(shape)
    return pl.BlockSpec(shape, lambda b, _z=zeros: _z)


# ----------------------------------------------------------------------------- kernels

def _embed_kernel(p_ref, w_ref, b_ref, cls_ref, pos_ref, o_ref):
    """Patch-embed matmul + cls concat + positional add for one batch element.

    p_ref:[1,N,Pdim] f32, w:[Pdim,D] bf16, b:[1,D] f32, cls:[1,D] f32, pos:[S,D] f32.
    o_ref:[1,S,D] f32.
    """
    patches = p_ref[0].astype(jnp.bfloat16)                      # [N, Pdim]
    tok = jnp.dot(patches, w_ref[...],
                  preferred_element_type=jnp.float32) + b_ref[...]  # [N, D] f32
    o_ref[0, 0:1, :] = cls_ref[...] + pos_ref[0:1, :]
    o_ref[0, 1:, :] = tok + pos_ref[1:, :]


def _block_kernel(x_ref, ln1_g, ln1_b, qkv_w, qkv_b, proj_w, proj_b,
                  ln2_g, ln2_b, fc1_w, fc1_b, fc2_w, fc2_b, o_ref,
                  *, heads, eps):
    """One full pre-norm transformer block for one batch element, fully in VMEM.

    x:[1,S,D] f32, qkv_w:[3,H,D,Dh] bf16 (scale pre-folded into q), qkv_b:[3,H,1,Dh] f32,
    proj_w:[H,Dh,D] bf16, fc1_w:[D,M] bf16, fc2_w:[M,D] bf16, biases/LN params f32.
    """
    x = x_ref[0]                                                  # [S, D] f32
    S, D = x.shape

    # ---- attention sub-block (pre-norm) ----
    h = _ln(x, ln1_g[...], ln1_b[...], eps)
    h_bf = h.astype(jnp.bfloat16)

    attn_acc = jnp.zeros((S, D), jnp.float32)
    for hd in range(heads):                                       # static unroll
        q = jnp.dot(h_bf, qkv_w[0, hd],
                    preferred_element_type=jnp.float32) + qkv_b[0, hd]   # [S, Dh], scaled
        k = jnp.dot(h_bf, qkv_w[1, hd],
                    preferred_element_type=jnp.float32) + qkv_b[1, hd]
        v = jnp.dot(h_bf, qkv_w[2, hd],
                    preferred_element_type=jnp.float32) + qkv_b[2, hd]

        # scores = q @ k^T (contraction over Dh, no explicit transpose)
        s = lax.dot_general(q.astype(jnp.bfloat16), k.astype(jnp.bfloat16),
                            (((1,), (1,)), ((), ())),
                            preferred_element_type=jnp.float32)          # [S, S]
        s = s - jnp.max(s, axis=-1, keepdims=True)
        p = jnp.exp(s)
        p = p * pl.reciprocal(jnp.sum(p, axis=-1, keepdims=True), approx=True)

        out_h = jnp.dot(p.astype(jnp.bfloat16), v.astype(jnp.bfloat16),
                        preferred_element_type=jnp.float32)              # [S, Dh]
        # head merge + output projection fused: sum_h out_h @ proj_w[h]
        attn_acc = attn_acc + jnp.dot(out_h.astype(jnp.bfloat16), proj_w[hd],
                                      preferred_element_type=jnp.float32)

    x1 = x + attn_acc + proj_b[...]                               # residual (f32)

    # ---- MLP sub-block (pre-norm) ----
    h2 = _ln(x1, ln2_g[...], ln2_b[...], eps)
    a = jnp.dot(h2.astype(jnp.bfloat16), fc1_w[...],
                preferred_element_type=jnp.float32) + fc1_b[...]
    a = _gelu_exact(a)
    y = jnp.dot(a.astype(jnp.bfloat16), fc2_w[...],
                preferred_element_type=jnp.float32) + fc2_b[...]

    o_ref[0] = x1 + y                                             # residual (f32)


def _head_kernel(x_ref, g_ref, b_ref, w_ref, hb_ref, o_ref, *, eps):
    """Final LayerNorm + classification head on cls tokens. x:[B,D], w:[D,Npad] bf16."""
    h = _ln(x_ref[...], g_ref[...], b_ref[...], eps)
    o_ref[...] = jnp.dot(h.astype(jnp.bfloat16), w_ref[...],
                         preferred_element_type=jnp.float32) + hb_ref[...]


# ----------------------------------------------------------------------------- wrappers

def patch_embed(patches, cls_tok, pos, w, b):
    """patches:[B,N,Pdim] f32 -> token sequence [B,S,D] f32 (cls + pos included)."""
    B, N, Pdim = patches.shape
    S, D = pos.shape
    assert S == N + 1
    return pl.pallas_call(
        _embed_kernel,
        out_shape=jax.ShapeDtypeStruct((B, S, D), jnp.float32),
        grid=(B,),
        in_specs=[
            pl.BlockSpec((1, N, Pdim), lambda bi: (bi, 0, 0)),
            _full_spec((Pdim, D)),
            _full_spec((1, D)),
            _full_spec((1, D)),
            _full_spec((S, D)),
        ],
        out_specs=pl.BlockSpec((1, S, D), lambda bi: (bi, 0, 0)),
        compiler_params=pltpu.CompilerParams(dimension_semantics=("parallel",)),
    )(patches, w, b, cls_tok, pos)


def transformer_block(xseq, blk, *, heads):
    """Fused pre-norm transformer block: xseq [B,S,D] f32 -> [B,S,D] f32."""
    B, S, D = xseq.shape
    H = heads
    Dh = D // H
    MLP = blk["fc1_b"].shape[-1]
    kernel = functools.partial(_block_kernel, heads=H, eps=_LN_EPS)
    return pl.pallas_call(
        kernel,
        out_shape=jax.ShapeDtypeStruct((B, S, D), jnp.float32),
        grid=(B,),
        in_specs=[
            pl.BlockSpec((1, S, D), lambda bi: (bi, 0, 0)),   # x
            _full_spec((1, D)), _full_spec((1, D)),           # ln1 g,b
            _full_spec((3, H, D, Dh)),                        # qkv w  (bf16, q pre-scaled)
            _full_spec((3, H, 1, Dh)),                        # qkv b
            _full_spec((H, Dh, D)), _full_spec((1, D)),       # proj w,b
            _full_spec((1, D)), _full_spec((1, D)),           # ln2 g,b
            _full_spec((D, MLP)), _full_spec((1, MLP)),       # fc1 w,b
            _full_spec((MLP, D)), _full_spec((1, D)),         # fc2 w,b
        ],
        out_specs=pl.BlockSpec((1, S, D), lambda bi: (bi, 0, 0)),
        compiler_params=pltpu.CompilerParams(dimension_semantics=("parallel",)),
    )(xseq, blk["ln1_g"], blk["ln1_b"], blk["qkv_w"], blk["qkv_b"],
      blk["proj_w"], blk["proj_b"], blk["ln2_g"], blk["ln2_b"],
      blk["fc1_w"], blk["fc1_b"], blk["fc2_w"], blk["fc2_b"])


def classifier_head(cls_tokens, ln_g, ln_b, head_w, head_b):
    """cls_tokens:[B,D] -> logits [B, Npad] (lane-dense; caller slices to num_classes)."""
    B, D = cls_tokens.shape
    Npad = head_w.shape[1]
    return pl.pallas_call(
        functools.partial(_head_kernel, eps=_LN_EPS),
        out_shape=jax.ShapeDtypeStruct((B, Npad), jnp.float32),
        grid=(1,),
        in_specs=[
            pl.BlockSpec((B, D), lambda i: (0, 0)),
            pl.BlockSpec((1, D), lambda i: (0, 0)),
            pl.BlockSpec((1, D), lambda i: (0, 0)),
            pl.BlockSpec((D, Npad), lambda i: (0, 0)),
            pl.BlockSpec((1, Npad), lambda i: (0, 0)),
        ],
        out_specs=pl.BlockSpec((B, Npad), lambda i: (0, 0)),
        compiler_params=pltpu.CompilerParams(dimension_semantics=("parallel",)),
    )(cls_tokens, ln_g, ln_b, head_w, head_b)


# ----------------------------------------------------------------------------- params

def init_params(key, *, channels, patch, dim, heads, depth, mlp_dim, num_classes,
                num_patches):
    """Standard-layout parameters (same math as the PyTorch module, random init)."""
    patch_dim = channels * patch * patch

    def dense(k, fan_in, fan_out):
        w = jax.random.normal(k, (fan_in, fan_out), jnp.float32) * 0.02
        b = jnp.zeros((fan_out,), jnp.float32)
        return w, b

    keys = jax.random.split(key, depth + 4)
    params = {}
    params["patch_w"], params["patch_b"] = dense(keys[0], patch_dim, dim)
    params["cls"] = jax.random.normal(keys[1], (1, 1, dim), jnp.float32) * 0.02
    params["pos"] = jax.random.normal(keys[2], (1, num_patches + 1, dim), jnp.float32) * 0.02

    blocks = []
    for i in range(depth):
        bk = jax.random.split(keys[3 + i], 4)
        blk = {
            "ln1_g": jnp.ones((dim,), jnp.float32), "ln1_b": jnp.zeros((dim,), jnp.float32),
            "ln2_g": jnp.ones((dim,), jnp.float32), "ln2_b": jnp.zeros((dim,), jnp.float32),
        }
        blk["qkv_w"], blk["qkv_b"] = dense(bk[0], dim, 3 * dim)
        blk["proj_w"], blk["proj_b"] = dense(bk[1], dim, dim)
        blk["fc1_w"], blk["fc1_b"] = dense(bk[2], dim, mlp_dim)
        blk["fc2_w"], blk["fc2_b"] = dense(bk[3], mlp_dim, dim)
        blocks.append(blk)
    params["blocks"] = blocks

    params["ln_g"] = jnp.ones((dim,), jnp.float32)
    params["ln_b"] = jnp.zeros((dim,), jnp.float32)
    # the replaced head: nn.Linear(num_features, num_classes)
    params["head_w"], params["head_b"] = dense(keys[-1], dim, num_classes)
    return params


def prepare_params(params, *, heads):
    """One-time (outside jit) kernel-layout prep:
    - qkv weight -> [3,H,D,Dh], proj weight -> [H,Dh,D] (head split done by layout,
      no runtime transposes),
    - attention scale Dh**-0.5 folded into the q projection,
    - matmul weights cast to bf16 once (f32 accumulation in-kernel),
    - classification head padded to a 128-lane-dense output.
    """
    D = params["ln_g"].shape[0]
    H = heads
    Dh = D // H
    scale = Dh ** -0.5

    out = {
        "patch_w": params["patch_w"].astype(jnp.bfloat16),
        "patch_b": params["patch_b"].reshape(1, D).astype(jnp.float32),
        "cls": params["cls"].reshape(1, D).astype(jnp.float32),
        "pos": params["pos"].reshape(-1, D).astype(jnp.float32),
        "ln_g": params["ln_g"].reshape(1, D).astype(jnp.float32),
        "ln_b": params["ln_b"].reshape(1, D).astype(jnp.float32),
    }

    blocks = []
    for blk in params["blocks"]:
        qkv_w = blk["qkv_w"].reshape(D, 3, H, Dh).transpose(1, 2, 0, 3)   # [3,H,D,Dh]
        qkv_b = blk["qkv_b"].reshape(3, H, 1, Dh)
        qkv_w = qkv_w.at[0].multiply(scale)     # fold q*scale into the projection
        qkv_b = qkv_b.at[0].multiply(scale)
        nb = {
            "ln1_g": blk["ln1_g"].reshape(1, D).astype(jnp.float32),
            "ln1_b": blk["ln1_b"].reshape(1, D).astype(jnp.float32),
            "ln2_g": blk["ln2_g"].reshape(1, D).astype(jnp.float32),
            "ln2_b": blk["ln2_b"].reshape(1, D).astype(jnp.float32),
            "qkv_w": qkv_w.astype(jnp.bfloat16),
            "qkv_b": qkv_b.astype(jnp.float32),
            "proj_w": blk["proj_w"].reshape(H, Dh, D).astype(jnp.bfloat16),
            "proj_b": blk["proj_b"].reshape(1, D).astype(jnp.float32),
            "fc1_w": blk["fc1_w"].astype(jnp.bfloat16),
            "fc1_b": blk["fc1_b"].reshape(1, -1).astype(jnp.float32),
            "fc2_w": blk["fc2_w"].astype(jnp.bfloat16),
            "fc2_b": blk["fc2_b"].reshape(1, D).astype(jnp.float32),
        }
        blocks.append(nb)
    out["blocks"] = blocks

    nc = params["head_b"].shape[0]
    nc_pad = max(128, ((nc + 127) // 128) * 128)
    head_w = jnp.zeros((D, nc_pad), jnp.float32).at[:, :nc].set(params["head_w"])
    head_b = jnp.zeros((1, nc_pad), jnp.float32).at[:, :nc].set(params["head_b"])
    out["head_w"] = head_w.astype(jnp.bfloat16)
    out["head_b"] = head_b
    return out


# ----------------------------------------------------------------------------- forward

def deit_forward(params, x, *, patch, heads, num_classes):
    B, C, Himg, Wimg = x.shape
    gh, gw = Himg // patch, Wimg // patch
    N = gh * gw
    pos = params["pos"]
    S, D = pos.shape
    assert S == N + 1

    # Patch extraction == Conv2d(C, D, k=P, s=P).flatten(2).transpose(1, 2).
    # Kept as a host-side reshape/transpose (cheap at this image size); the embedding
    # matmul, cls-token concat and positional add are fused in one Pallas kernel.
    patches = (x.reshape(B, C, gh, patch, gw, patch)
                 .transpose(0, 2, 4, 1, 3, 5)
                 .reshape(B, N, C * patch * patch))

    xseq = patch_embed(patches, params["cls"], pos, params["patch_w"], params["patch_b"])

    for blk in params["blocks"]:
        xseq = transformer_block(xseq, blk, heads=heads)

    cls_out = xseq[:, 0, :]                                            # [B, D]
    logits_padded = classifier_head(cls_out, params["ln_g"], params["ln_b"],
                                    params["head_w"], params["head_b"])
    return logits_padded[:, :num_classes]


# ----------------------------------------------------------------------------- main

if __name__ == "__main__":
    # small config consistent with the module's forward (scaled-down DeiT)
    B, C, IMG = 2, 3, 32
    PATCH, DIM, HEADS, DEPTH = 16, 64, 4, 2
    MLP_DIM = 4 * DIM
    NUM_CLASSES = 10
    N_PATCHES = (IMG // PATCH) ** 2

    root = jax.random.PRNGKey(0)
    kx, kp = jax.random.split(root)
    x = jax.random.normal(kx, (B, C, IMG, IMG), jnp.float32)
    raw_params = init_params(kp, channels=C, patch=PATCH, dim=DIM, heads=HEADS,
                             depth=DEPTH, mlp_dim=MLP_DIM, num_classes=NUM_CLASSES,
                             num_patches=N_PATCHES)
    params = prepare_params(raw_params, heads=HEADS)   # layout prep + bf16 casts, once

    fwd = jax.jit(functools.partial(deit_forward, patch=PATCH, heads=HEADS,
                                    num_classes=NUM_CLASSES))
    logits = fwd(params, x)
    jax.block_until_ready(logits)
    assert logits.shape == (B, NUM_CLASSES)
    assert bool(jnp.all(jnp.isfinite(logits)))
    print("KERNEL_OK")
</pallas_src>

<mosaic_0001>
module attributes {stable_mosaic.version = 11 : i64} {
  func.func @_embed_kernel(%arg0: i32, %arg1: memref<1x4x768xf32, #tpu.memory_space<vmem>>, %arg2: memref<768x64xbf16, #tpu.memory_space<vmem>>, %arg3: memref<1x64xf32, #tpu.memory_space<vmem>>, %arg4: memref<1x64xf32, #tpu.memory_space<vmem>>, %arg5: memref<5x64xf32, #tpu.memory_space<vmem>>, %arg6: memref<1x5x64xf32, #tpu.memory_space<vmem>>) attributes {dimension_semantics = [#tpu.dimension_semantics<parallel>], iteration_bounds = array<i64: 2>, scalar_prefetch = 0 : i64, scratch_operands = 0 : i64, tpu.core_type = #tpu.core_type<tc>, window_params = [{transform_indices = @transform_0, window_bounds = array<i64: 1, 4, 768>}, {pipeline_mode = #tpu.pipeline_mode<synchronous>, transform_indices = @transform_1, window_bounds = array<i64: 768, 64>}, {pipeline_mode = #tpu.pipeline_mode<synchronous>, transform_indices = @transform_2, window_bounds = array<i64: 1, 64>}, {pipeline_mode = #tpu.pipeline_mode<synchronous>, transform_indices = @transform_3, window_bounds = array<i64: 1, 64>}, {pipeline_mode = #tpu.pipeline_mode<synchronous>, transform_indices = @transform_4, window_bounds = array<i64: 5, 64>}, {transform_indices = @transform_5, window_bounds = array<i64: 1, 5, 64>}]} {
    %c0 = arith.constant 0 : index
    %c0_0 = arith.constant 0 : index
    %c0_1 = arith.constant 0 : index
    %0 = vector.load %arg1[%c0, %c0_0, %c0_1] : memref<1x4x768xf32, #tpu.memory_space<vmem>>, vector<1x4x768xf32>
    %1 = vector.shape_cast %0 : vector<1x4x768xf32> to vector<4x768xf32>
    %2 = arith.truncf %1 : vector<4x768xf32> to vector<4x768xbf16>
    %c0_2 = arith.constant 0 : index
    %c0_3 = arith.constant 0 : index
    %3 = vector.load %arg2[%c0_2, %c0_3] : memref<768x64xbf16, #tpu.memory_space<vmem>>, vector<768x64xbf16>
    %cst = arith.constant dense<0.000000e+00> : vector<4x64xf32>
    %4 = tpu.matmul %2, %3, %cst {dimension_numbers = #tpu.dot_dimension_numbers<[1], [0], [0], [1], [0, 0, 1, 1], [], []>} : vector<4x768xbf16>, vector<768x64xbf16>, vector<4x64xf32> -> vector<4x64xf32>
    %c0_4 = arith.constant 0 : index
    %c0_5 = arith.constant 0 : index
    %5 = vector.load %arg3[%c0_4, %c0_5] : memref<1x64xf32, #tpu.memory_space<vmem>>, vector<1x64xf32>
    %6 = vector.broadcast %5 : vector<1x64xf32> to vector<4x64xf32>
    %7 = arith.addf %4, %6 : vector<4x64xf32>
    %c0_6 = arith.constant 0 : index
    %c0_7 = arith.constant 0 : index
    %8 = vector.load %arg4[%c0_6, %c0_7] : memref<1x64xf32, #tpu.memory_space<vmem>>, vector<1x64xf32>
    %c0_8 = arith.constant 0 : index
    %c0_9 = arith.constant 0 : index
    %9 = vector.load %arg5[%c0_8, %c0_9] : memref<5x64xf32, #tpu.memory_space<vmem>>, vector<1x64xf32>
    %10 = arith.addf %8, %9 : vector<1x64xf32>
    %c0_10 = arith.constant 0 : index
    %c0_11 = arith.constant 0 : index
    %c0_12 = arith.constant 0 : index
    %11 = vector.load %arg6[%c0_10, %c0_11, %c0_12] : memref<1x5x64xf32, #tpu.memory_space<vmem>>, vector<1x1x64xf32>
    %12 = vector.shape_cast %11 : vector<1x1x64xf32> to vector<1x64xf32>
    %13 = vector.shape_cast %10 : vector<1x64xf32> to vector<1x1x64xf32>
    tpu.vector_store %arg6[%c0_10, %c0_11, %c0_12], %13 {strides = array<i32>} : memref<1x5x64xf32, #tpu.memory_space<vmem>>, vector<1x1x64xf32>,
    %c1 = arith.constant 1 : index
    %c0_13 = arith.constant 0 : index
    %14 = vector.load %arg5[%c1, %c0_13] : memref<5x64xf32, #tpu.memory_space<vmem>>, vector<4x64xf32>
    %15 = arith.addf %7, %14 : vector<4x64xf32>
    %c0_14 = arith.constant 0 : index
    %c1_15 = arith.constant 1 : index
    %c0_16 = arith.constant 0 : index
    %16 = vector.load %arg6[%c0_14, %c1_15, %c0_16] : memref<1x5x64xf32, #tpu.memory_space<vmem>>, vector<1x4x64xf32>
    %17 = vector.shape_cast %16 : vector<1x4x64xf32> to vector<4x64xf32>
    %18 = vector.shape_cast %15 : vector<4x64xf32> to vector<1x4x64xf32>
    tpu.vector_store %arg6[%c0_14, %c1_15, %c0_16], %18 {strides = array<i32>} : memref<1x5x64xf32, #tpu.memory_space<vmem>>, vector<1x4x64xf32>,
    return
  }
  func.func @transform_0(%arg0: i32) -> (i32, i32, i32) {
    %c0_i32 = arith.constant 0 : i32
    %c0_i32_0 = arith.constant 0 : i32
    %c0_i32_1 = arith.constant 0 : i32
    return %arg0, %c0_i32, %c0_i32_0 : i32, i32, i32
  }
  func.func @transform_1(%arg0: i32) -> (i32, i32) {
    %c0_i32 = arith.constant 0 : i32
    %c0_i32_0 = arith.constant 0 : i32
    %c0_i32_1 = arith.constant 0 : i32
    return %c0_i32, %c0_i32_0 : i32, i32
  }
  func.func @transform_2(%arg0: i32) -> (i32, i32) {
    %c0_i32 = arith.constant 0 : i32
    %c0_i32_0 = arith.constant 0 : i32
    %c0_i32_1 = arith.constant 0 : i32
    return %c0_i32, %c0_i32_0 : i32, i32
  }
  func.func @transform_3(%arg0: i32) -> (i32, i32) {
    %c0_i32 = arith.constant 0 : i32
    %c0_i32_0 = arith.constant 0 : i32
    %c0_i32_1 = arith.constant 0 : i32
    return %c0_i32, %c0_i32_0 : i32, i32
  }
  func.func @transform_4(%arg0: i32) -> (i32, i32) {
    %c0_i32 = arith.constant 0 : i32
    %c0_i32_0 = arith.constant 0 : i32
    %c0_i32_1 = arith.constant 0 : i32
    return %c0_i32, %c0_i32_0 : i32, i32
  }
  func.func @transform_5(%arg0: i32) -> (i32, i32, i32) {
    %c0_i32 = arith.constant 0 : i32
    %c0_i32_0 = arith.constant 0 : i32
    %c0_i32_1 = arith.constant 0 : i32
    return %arg0, %c0_i32, %c0_i32_0 : i32, i32, i32
  }
}

module attributes {stable_mosaic.version = 11 : i64} {
  func.func @_block_kernel(%arg0: i32, %arg1: memref<1x5x64xf32, #tpu.memory_space<vmem>>, %arg2: memref<1x64xf32, #tpu.memory_space<vmem>>, %arg3: memref<1x64xf32, #tpu.memory_space<vmem>>, %arg4: memref<3x4x64x16xbf16, #tpu.memory_space<vmem>>, %arg5: memref<3x4x1x16xf32, #tpu.memory_space<vmem>>, %arg6: memref<4x16x64xbf16, #tpu.memory_space<vmem>>, %arg7: memref<1x64xf32, #tpu.memory_space<vmem>>, %arg8: memref<1x64xf32, #tpu.memory_space<vmem>>, %arg9: memref<1x64xf32, #tpu.memory_space<vmem>>, %arg10: memref<64x256xbf16, #tpu.memory_space<vmem>>, %arg11: memref<1x256xf32, #tpu.memory_space<vmem>>, %arg12: memref<256x64xbf16, #tpu.memory_space<vmem>>, %arg13: memref<1x64xf32, #tpu.memory_space<vmem>>, %arg14: memref<1x5x64xf32, #tpu.memory_space<vmem>>) attributes {dimension_semantics = [#tpu.dimension_semantics<parallel>], iteration_bounds = array<i64: 2>, scalar_prefetch = 0 : i64, scratch_operands = 0 : i64, tpu.core_type = #tpu.core_type<tc>, window_params = [{transform_indices = @transform_0, window_bounds = array<i64: 1, 5, 64>}, {pipeline_mode = #tpu.pipeline_mode<synchronous>, transform_indices = @transform_1, window_bounds = array<i64: 1, 64>}, {pipeline_mode = #tpu.pipeline_mode<synchronous>, transform_indices = @transform_2, window_bounds = array<i64: 1, 64>}, {pipeline_mode = #tpu.pipeline_mode<synchronous>, transform_indices = @transform_3, window_bounds = array<i64: 3, 4, 64, 16>}, {pipeline_mode = #tpu.pipeline_mode<synchronous>, transform_indices = @transform_4, window_bounds = array<i64: 3, 4, 1, 16>}, {pipeline_mode = #tpu.pipeline_mode<synchronous>, transform_indices = @transform_5, window_bounds = array<i64: 4, 16, 64>}, {pipeline_mode = #tpu.pipeline_mode<synchronous>, transform_indices = @transform_6, window_bounds = array<i64: 1, 64>}, {pipeline_mode = #tpu.pipeline_mode<synchronous>, transform_indices = @transform_7, window_bounds = array<i64: 1, 64>}, {pipeline_mode = #tpu.pipeline_mode<synchronous>, transform_indices = @transform_8, window_bounds = array<i64: 1, 64>}, {pipeline_mode = #tpu.pipeline_mode<synchronous>, transform_indices = @transform_9, window_bounds = array<i64: 64, 256>}, {pipeline_mode = #tpu.pipeline_mode<synchronous>, transform_indices = @transform_10, window_bounds = array<i64: 1, 256>}, {pipeline_mode = #tpu.pipeline_mode<synchronous>, transform_indices = @transform_11, window_bounds = array<i64: 256, 64>}, {pipeline_mode = #tpu.pipeline_mode<synchronous>, transform_indices = @transform_12, window_bounds = array<i64: 1, 64>}, {transform_indices = @transform_13, window_bounds = array<i64: 1, 5, 64>}]} {
    %c0 = arith.constant 0 : index
    %c0_0 = arith.constant 0 : index
    %c0_1 = arith.constant 0 : index
    %0 = vector.load %arg1[%c0, %c0_0, %c0_1] : memref<1x5x64xf32, #tpu.memory_space<vmem>>, vector<1x5x64xf32>
    %1 = vector.shape_cast %0 : vector<1x5x64xf32> to vector<5x64xf32>
    %c0_2 = arith.constant 0 : index
    %c0_3 = arith.constant 0 : index
    %2 = vector.load %arg2[%c0_2, %c0_3] : memref<1x64xf32, #tpu.memory_space<vmem>>, vector<1x64xf32>
    %c0_4 = arith.constant 0 : index
    %c0_5 = arith.constant 0 : index
    %3 = vector.load %arg3[%c0_4, %c0_5] : memref<1x64xf32, #tpu.memory_space<vmem>>, vector<1x64xf32>
    %cst = arith.constant dense<0.000000e+00> : vector<5xf32>
    %4 = vector.multi_reduction <add>, %1, %cst [1] : vector<5x64xf32> to vector<5xf32>
    %5 = vector.shape_cast %4 : vector<5xf32> to vector<5x1xf32>
    %cst_6 = arith.constant 6.400000e+01 : f32
    %6 = vector.broadcast %cst_6 : f32 to vector<5x1xf32>
    %7 = arith.divf %5, %6 : vector<5x1xf32>
    %8 = vector.broadcast %7 : vector<5x1xf32> to vector<5x64xf32>
    %9 = arith.subf %1, %8 : vector<5x64xf32>
    %10 = arith.mulf %9, %9 : vector<5x64xf32>
    %cst_7 = arith.constant dense<0.000000e+00> : vector<5xf32>
    %11 = vector.multi_reduction <add>, %10, %cst_7 [1] : vector<5x64xf32> to vector<5xf32>
    %12 = vector.shape_cast %11 : vector<5xf32> to vector<5x1xf32>
    %cst_8 = arith.constant 6.400000e+01 : f32
    %13 = vector.broadcast %cst_8 : f32 to vector<5x1xf32>
    %14 = arith.divf %12, %13 : vector<5x1xf32>
    %cst_9 = arith.constant 9.99999997E-7 : f32
    %15 = vector.broadcast %cst_9 : f32 to vector<5x1xf32>
    %16 = arith.addf %14, %15 : vector<5x1xf32>
    %17 = math.rsqrt %16 : vector<5x1xf32>
    %18 = vector.broadcast %17 : vector<5x1xf32> to vector<5x64xf32>
    %19 = arith.mulf %9, %18 : vector<5x64xf32>
    %20 = vector.broadcast %2 : vector<1x64xf32> to vector<5x64xf32>
    %21 = arith.mulf %19, %20 : vector<5x64xf32>
    %22 = vector.broadcast %3 : vector<1x64xf32> to vector<5x64xf32>
    %23 = arith.addf %21, %22 : vector<5x64xf32>
    %24 = arith.truncf %23 : vector<5x64xf32> to vector<5x64xbf16>
    %cst_10 = arith.constant 0.000000e+00 : f32
    %25 = vector.broadcast %cst_10 : f32 to vector<5x64xf32>
    %c0_11 = arith.constant 0 : index
    %c0_12 = arith.constant 0 : index
    %c0_13 = arith.constant 0 : index
    %c0_14 = arith.constant 0 : index
    %26 = vector.load %arg4[%c0_11, %c0_12, %c0_13, %c0_14] : memref<3x4x64x16xbf16, #tpu.memory_space<vmem>>, vector<1x1x64x16xbf16>
    %27 = vector.shape_cast %26 : vector<1x1x64x16xbf16> to vector<64x16xbf16>
    %cst_15 = arith.constant dense<0.000000e+00> : vector<5x16xf32>
    %28 = tpu.matmul %24, %27, %cst_15 {dimension_numbers = #tpu.dot_dimension_numbers<[1], [0], [0], [1], [0, 0, 1, 1], [], []>} : vector<5x64xbf16>, vector<64x16xbf16>, vector<5x16xf32> -> vector<5x16xf32>
    %c0_16 = arith.constant 0 : index
    %c0_17 = arith.constant 0 : index
    %c0_18 = arith.constant 0 : index
    %c0_19 = arith.constant 0 : index
    %29 = vector.load %arg5[%c0_16, %c0_17, %c0_18, %c0_19] : memref<3x4x1x16xf32, #tpu.memory_space<vmem>>, vector<1x1x1x16xf32>
    %30 = vector.shape_cast %29 : vector<1x1x1x16xf32> to vector<1x16xf32>
    %31 = vector.broadcast %30 : vector<1x16xf32> to vector<5x16xf32>
    %32 = arith.addf %28, %31 : vector<5x16xf32>
    %c1 = arith.constant 1 : index
    %c0_20 = arith.constant 0 : index
    %c0_21 = arith.constant 0 : index
    %c0_22 = arith.constant 0 : index
    %33 = vector.load %arg4[%c1, %c0_20, %c0_21, %c0_22] : memref<3x4x64x16xbf16, #tpu.memory_space<vmem>>, vector<1x1x64x16xbf16>
    %34 = vector.shape_cast %33 : vector<1x1x64x16xbf16> to vector<64x16xbf16>
    %cst_23 = arith.constant dense<0.000000e+00> : vector<5x16xf32>
    %35 = tpu.matmul %24, %34, %cst_23 {dimension_numbers = #tpu.dot_dimension_numbers<[1], [0], [0], [1], [0, 0, 1, 1], [], []>} : vector<5x64xbf16>, vector<64x16xbf16>, vector<5x16xf32> -> vector<5x16xf32>
    %c1_24 = arith.constant 1 : index
    %c0_25 = arith.constant 0 : index
    %c0_26 = arith.constant 0 : index
    %c0_27 = arith.constant 0 : index
    %36 = vector.load %arg5[%c1_24, %c0_25, %c0_26, %c0_27] : memref<3x4x1x16xf32, #tpu.memory_space<vmem>>, vector<1x1x1x16xf32>
    %37 = vector.shape_cast %36 : vector<1x1x1x16xf32> to vector<1x16xf32>
    %38 = vector.broadcast %37 : vector<1x16xf32> to vector<5x16xf32>
    %39 = arith.addf %35, %38 : vector<5x16xf32>
    %c2 = arith.constant 2 : index
    %c0_28 = arith.constant 0 : index
    %c0_29 = arith.constant 0 : index
    %c0_30 = arith.constant 0 : index
    %40 = vector.load %arg4[%c2, %c0_28, %c0_29, %c0_30] : memref<3x4x64x16xbf16, #tpu.memory_space<vmem>>, vector<1x1x64x16xbf16>
    %41 = vector.shape_cast %40 : vector<1x1x64x16xbf16> to vector<64x16xbf16>
    %cst_31 = arith.constant dense<0.000000e+00> : vector<5x16xf32>
    %42 = tpu.matmul %24, %41, %cst_31 {dimension_numbers = #tpu.dot_dimension_numbers<[1], [0], [0], [1], [0, 0, 1, 1], [], []>} : vector<5x64xbf16>, vector<64x16xbf16>, vector<5x16xf32> -> vector<5x16xf32>
    %c2_32 = arith.constant 2 : index
    %c0_33 = arith.constant 0 : index
    %c0_34 = arith.constant 0 : index
    %c0_35 = arith.constant 0 : index
    %43 = vector.load %arg5[%c2_32, %c0_33, %c0_34, %c0_35] : memref<3x4x1x16xf32, #tpu.memory_space<vmem>>, vector<1x1x1x16xf32>
    %44 = vector.shape_cast %43 : vector<1x1x1x16xf32> to vector<1x16xf32>
    %45 = vector.broadcast %44 : vector<1x16xf32> to vector<5x16xf32>
    %46 = arith.addf %42, %45 : vector<5x16xf32>
    %47 = arith.truncf %32 : vector<5x16xf32> to vector<5x16xbf16>
    %48 = arith.truncf %39 : vector<5x16xf32> to vector<5x16xbf16>
    %cst_36 = arith.constant dense<0.000000e+00> : vector<5x5xf32>
    %49 = tpu.matmul %47, %48, %cst_36 {dimension_numbers = #tpu.dot_dimension_numbers<[1], [1], [0], [0], [0, 0, 1, 0], [], []>} : vector<5x16xbf16>, vector<5x16xbf16>, vector<5x5xf32> -> vector<5x5xf32>
    %cst_37 = arith.constant dense<0xFF800000> : vector<5xf32>
    %50 = vector.multi_reduction <maximumf>, %49, %cst_37 [1] : vector<5x5xf32> to vector<5xf32>
    %51 = vector.shape_cast %50 : vector<5xf32> to vector<5x1xf32>
    %52 = vector.broadcast %51 : vector<5x1xf32> to vector<5x5xf32>
    %53 = arith.subf %49, %52 : vector<5x5xf32>
    %54 = math.exp %53 : vector<5x5xf32>
    %cst_38 = arith.constant dense<0.000000e+00> : vector<5xf32>
    %55 = vector.multi_reduction <add>, %54, %cst_38 [1] : vector<5x5xf32> to vector<5xf32>
    %56 = vector.shape_cast %55 : vector<5xf32> to vector<5x1xf32>
    %57 = tpu.reciprocal %56 {approx = true} : vector<5x1xf32> -> vector<5x1xf32>
    %58 = vector.broadcast %57 : vector<5x1xf32> to vector<5x5xf32>
    %59 = arith.mulf %54, %58 : vector<5x5xf32>
    %60 = arith.truncf %59 : vector<5x5xf32> to vector<5x5xbf16>
    %61 = arith.truncf %46 : vector<5x16xf32> to vector<5x16xbf16>
    %cst_39 = arith.constant dense<0.000000e+00> : vector<5x16xf32>
    %62 = tpu.matmul %60, %61, %cst_39 {dimension_numbers = #tpu.dot_dimension_numbers<[1], [0], [0], [1], [0, 0, 1, 1], [], []>} : vector<5x5xbf16>, vector<5x16xbf16>, vector<5x16xf32> -> vector<5x16xf32>
    %63 = arith.truncf %62 : vector<5x16xf32> to vector<5x16xbf16>
    %c0_40 = arith.constant 0 : index
    %c0_41 = arith.constant 0 : index
    %c0_42 = arith.constant 0 : index
    %64 = vector.load %arg6[%c0_40, %c0_41, %c0_42] : memref<4x16x64xbf16, #tpu.memory_space<vmem>>, vector<1x16x64xbf16>
    %65 = vector.shape_cast %64 : vector<1x16x64xbf16> to vector<16x64xbf16>
    %cst_43 = arith.constant dense<0.000000e+00> : vector<5x64xf32>
    %66 = tpu.matmul %63, %65, %cst_43 {dimension_numbers = #tpu.dot_dimension_numbers<[1], [0], [0], [1], [0, 0, 1, 1], [], []>} : vector<5x16xbf16>, vector<16x64xbf16>, vector<5x64xf32> -> vector<5x64xf32>
    %67 = arith.addf %25, %66 : vector<5x64xf32>
    %c0_44 = arith.constant 0 : index
    %c1_45 = arith.constant 1 : index
    %c0_46 = arith.constant 0 : index
    %c0_47 = arith.constant 0 : index
    %68 = vector.load %arg4[%c0_44, %c1_45, %c0_46, %c0_47] : memref<3x4x64x16xbf16, #tpu.memory_space<vmem>>, vector<1x1x64x16xbf16>
    %69 = vector.shape_cast %68 : vector<1x1x64x16xbf16> to vector<64x16xbf16>
    %cst_48 = arith.constant dense<0.000000e+00> : vector<5x16xf32>
    %70 = tpu.matmul %24, %69, %cst_48 {dimension_numbers = #tpu.dot_dimension_numbers<[1], [0], [0], [1], [0, 0, 1, 1], [], []>} : vector<5x64xbf16>, vector<64x16xbf16>, vector<5x16xf32> -> vector<5x16xf32>
    %c0_49 = arith.constant 0 : index
    %c1_50 = arith.constant 1 : index
    %c0_51 = arith.constant 0 : index
    %c0_52 = arith.constant 0 : index
    %71 = vector.load %arg5[%c0_49, %c1_50, %c0_51, %c0_52] : memref<3x4x1x16xf32, #tpu.memory_space<vmem>>, vector<1x1x1x16xf32>
    %72 = vector.shape_cast %71 : vector<1x1x1x16xf32> to vector<1x16xf32>
    %73 = vector.broadcast %72 : vector<1x16xf32> to vector<5x16xf32>
    %74 = arith.addf %70, %73 : vector<5x16xf32>
    %c1_53 = arith.constant 1 : index
    %c1_54 = arith.constant 1 : index
    %c0_55 = arith.constant 0 : index
    %c0_56 = arith.constant 0 : index
    %75 = vector.load %arg4[%c1_53, %c1_54, %c0_55, %c0_56] : memref<3x4x64x16xbf16, #tpu.memory_space<vmem>>, vector<1x1x64x16xbf16>
    %76 = vector.shape_cast %75 : vector<1x1x64x16xbf16> to vector<64x16xbf16>
    %cst_57 = arith.constant dense<0.000000e+00> : vector<5x16xf32>
    %77 = tpu.matmul %24, %76, %cst_57 {dimension_numbers = #tpu.dot_dimension_numbers<[1], [0], [0], [1], [0, 0, 1, 1], [], []>} : vector<5x64xbf16>, vector<64x16xbf16>, vector<5x16xf32> -> vector<5x16xf32>
    %c1_58 = arith.constant 1 : index
    %c1_59 = arith.constant 1 : index
    %c0_60 = arith.constant 0 : index
    %c0_61 = arith.constant 0 : index
    %78 = vector.load %arg5[%c1_58, %c1_59, %c0_60, %c0_61] : memref<3x4x1x16xf32, #tpu.memory_space<vmem>>, vector<1x1x1x16xf32>
    %79 = vector.shape_cast %78 : vector<1x1x1x16xf32> to vector<1x16xf32>
    %80 = vector.broadcast %79 : vector<1x16xf32> to vector<5x16xf32>
    %81 = arith.addf %77, %80 : vector<5x16xf32>
    %c2_62 = arith.constant 2 : index
    %c1_63 = arith.constant 1 : index
    %c0_64 = arith.constant 0 : index
    %c0_65 = arith.constant 0 : index
    %82 = vector.load %arg4[%c2_62, %c1_63, %c0_64, %c0_65] : memref<3x4x64x16xbf16, #tpu.memory_space<vmem>>, vector<1x1x64x16xbf16>
    %83 = vector.shape_cast %82 : vector<1x1x64x16xbf16> to vector<64x16xbf16>
    %cst_66 = arith.constant dense<0.000000e+00> : vector<5x16xf32>
    %84 = tpu.matmul %24, %83, %cst_66 {dimension_numbers = #tpu.dot_dimension_numbers<[1], [0], [0], [1], [0, 0, 1, 1], [], []>} : vector<5x64xbf16>, vector<64x16xbf16>, vector<5x16xf32> -> vector<5x16xf32>
    %c2_67 = arith.constant 2 : index
    %c1_68 = arith.constant 1 : index
    %c0_69 = arith.constant 0 : index
    %c0_70 = arith.constant 0 : index
    %85 = vector.load %arg5[%c2_67, %c1_68, %c0_69, %c0_70] : memref<3x4x1x16xf32, #tpu.memory_space<vmem>>, vector<1x1x1x16xf32>
    %86 = vector.shape_cast %85 : vector<1x1x1x16xf32> to vector<1x16xf32>
    %87 = vector.broadcast %86 : vector<1x16xf32> to vector<5x16xf32>
    %88 = arith.addf %84, %87 : vector<5x16xf32>
    %89 = arith.truncf %74 : vector<5x16xf32> to vector<5x16xbf16>
    %90 = arith.truncf %81 : vector<5x16xf32> to vector<5x16xbf16>
    %cst_71 = arith.constant dense<0.000000e+00> : vector<5x5xf32>
    %91 = tpu.matmul %89, %90, %cst_71 {dimension_numbers = #tpu.dot_dimension_numbers<[1], [1], [0], [0], [0, 0, 1, 0], [], []>} : vector<5x16xbf16>, vector<5x16xbf16>, vector<5x5xf32> -> vector<5x5xf32>
    %cst_72 = arith.constant dense<0xFF800000> : vector<5xf32>
    %92 = vector.multi_reduction <maximumf>, %91, %cst_72 [1] : vector<5x5xf32> to vector<5xf32>
    %93 = vector.shape_cast %92 : vector<5xf32> to vector<5x1xf32>
    %94 = vector.broadcast %93 : vector<5x1xf32> to vector<5x5xf32>
    %95 = arith.subf %91, %94 : vector<5x5xf32>
    %96 = math.exp %95 : vector<5x5xf32>
    %cst_73 = arith.constant dense<0.000000e+00> : vector<5xf32>
    %97 = vector.multi_reduction <add>, %96, %cst_73 [1] : vector<5x5xf32> to vector<5xf32>
    %98 = vector.shape_cast %97 : vector<5xf32> to vector<5x1xf32>
    %99 = tpu.reciprocal %98 {approx = true} : vector<5x1xf32> -> vector<5x1xf32>
    %100 = vector.broadcast %99 : vector<5x1xf32> to vector<5x5xf32>
    %101 = arith.mulf %96, %100 : vector<5x5xf32>
    %102 = arith.truncf %101 : vector<5x5xf32> to vector<5x5xbf16>
    %103 = arith.truncf %88 : vector<5x16xf32> to vector<5x16xbf16>
    %cst_74 = arith.constant dense<0.000000e+00> : vector<5x16xf32>
    %104 = tpu.matmul %102, %103, %cst_74 {dimension_numbers = #tpu.dot_dimension_numbers<[1], [0], [0], [1], [0, 0, 1, 1], [], []>} : vector<5x5xbf16>, vector<5x16xbf16>, vector<5x16xf32> -> vector<5x16xf32>
    %105 = arith.truncf %104 : vector<5x16xf32> to vector<5x16xbf16>
    %c1_75 = arith.constant 1 : index
    %c0_76 = arith.constant 0 : index
    %c0_77 = arith.constant 0 : index
    %106 = vector.load %arg6[%c1_75, %c0_76, %c0_77] : memref<4x16x64xbf16, #tpu.memory_space<vmem>>, vector<1x16x64xbf16>
    %107 = vector.shape_cast %106 : vector<1x16x64xbf16> to vector<16x64xbf16>
    %cst_78 = arith.constant dense<0.000000e+00> : vector<5x64xf32>
    %108 = tpu.matmul %105, %107, %cst_78 {dimension_numbers = #tpu.dot_dimension_numbers<[1], [0], [0], [1], [0, 0, 1, 1], [], []>} : vector<5x16xbf16>, vector<16x64xbf16>, vector<5x64xf32> -> vector<5x64xf32>
    %109 = arith.addf %67, %108 : vector<5x64xf32>
    %c0_79 = arith.constant 0 : index
    %c2_80 = arith.constant 2 : index
    %c0_81 = arith.constant 0 : index
    %c0_82 = arith.constant 0 : index
    %110 = vector.load %arg4[%c0_79, %c2_80, %c0_81, %c0_82] : memref<3x4x64x16xbf16, #tpu.memory_space<vmem>>, vector<1x1x64x16xbf16>
    %111 = vector.shape_cast %110 : vector<1x1x64x16xbf16> to vector<64x16xbf16>
    %cst_83 = arith.constant dense<0.000000e+00> : vector<5x16xf32>
    %112 = tpu.matmul %24, %111, %cst_83 {dimension_numbers = #tpu.dot_dimension_numbers<[1], [0], [0], [1], [0, 0, 1, 1], [], []>} : vector<5x64xbf16>, vector<64x16xbf16>, vector<5x16xf32> -> vector<5x16xf32>
    %c0_84 = arith.constant 0 : index
    %c2_85 = arith.constant 2 : index
    %c0_86 = arith.constant 0 : index
    %c0_87 = arith.constant 0 : index
    %113 = vector.load %arg5[%c0_84, %c2_85, %c0_86, %c0_87] : memref<3x4x1x16xf32, #tpu.memory_space<vmem>>, vector<1x1x1x16xf32>
    %114 = vector.shape_cast %113 : vector<1x1x1x16xf32> to vector<1x16xf32>
    %115 = vector.broadcast %114 : vector<1x16xf32> to vector<5x16xf32>
    %116 = arith.addf %112, %115 : vector<5x16xf32>
    %c1_88 = arith.constant 1 : index
    %c2_89 = arith.constant 2 : index
    %c0_90 = arith.constant 0 : index
    %c0_91 = arith.constant 0 : index
    %117 = vector.load %arg4[%c1_88, %c2_89, %c0_90, %c0_91] : memref<3x4x64x16xbf16, #tpu.memory_space<vmem>>, vector<1x1x64x16xbf16>
    %118 = vector.shape_cast %117 : vector<1x1x64x16xbf16> to vector<64x16xbf16>
    %cst_92 = arith.constant dense<0.000000e+00> : vector<5x16xf32>
    %119 = tpu.matmul %24, %118, %cst_92 {dimension_numbers = #tpu.dot_dimension_numbers<[1], [0], [0], [1], [0, 0, 1, 1], [], []>} : vector<5x64xbf16>, vector<64x16xbf16>, vector<5x16xf32> -> vector<5x16xf32>
    %c1_93 = arith.constant 1 : index
    %c2_94 = arith.constant 2 : index
    %c0_95 = arith.constant 0 : index
    %c0_96 = arith.constant 0 : index
    %120 = vector.load %arg5[%c1_93, %c2_94, %c0_95, %c0_96] : memref<3x4x1x16xf32, #tpu.memory_space<vmem>>, vector<1x1x1x16xf32>
    %121 = vector.shape_cast %120 : vector<1x1x1x16xf32> to vector<1x16xf32>
    %122 = vector.broadcast %121 : vector<1x16xf32> to vector<5x16xf32>
    %123 = arith.addf %119, %122 : vector<5x16xf32>
    %c2_97 = arith.constant 2 : index
    %c2_98 = arith.constant 2 : index
    %c0_99 = arith.constant 0 : index
    %c0_100 = arith.constant 0 : index
    %124 = vector.load %arg4[%c2_97, %c2_98, %c0_99, %c0_100] : memref<3x4x64x16xbf16, #tpu.memory_space<vmem>>, vector<1x1x64x16xbf16>
    %125 = vector.shape_cast %124 : vector<1x1x64x16xbf16> to vector<64x16xbf16>
    %cst_101 = arith.constant dense<0.000000e+00> : vector<5x16xf32>
    %126 = tpu.matmul %24, %125, %cst_101 {dimension_numbers = #tpu.dot_dimension_numbers<[1], [0], [0], [1], [0, 0, 1, 1], [], []>} : vector<5x64xbf16>, vector<64x16xbf16>, vector<5x16xf32> -> vector<5x16xf32>
    %c2_102 = arith.constant 2 : index
    %c2_103 = arith.constant 2 : index
    %c0_104 = arith.constant 0 : index
    %c0_105 = arith.constant 0 : index
    %127 = vector.load %arg5[%c2_102, %c2_103, %c0_104, %c0_105] : memref<3x4x1x16xf32, #tpu.memory_space<vmem>>, vector<1x1x1x16xf32>
    %128 = vector.shape_cast %127 : vector<1x1x1x16xf32> to vector<1x16xf32>
    %129 = vector.broadcast %128 : vector<1x16xf32> to vector<5x16xf32>
    %130 = arith.addf %126, %129 : vector<5x16xf32>
    %131 = arith.truncf %116 : vector<5x16xf32> to vector<5x16xbf16>
    %132 = arith.truncf %123 : vector<5x16xf32> to vector<5x16xbf16>
    %cst_106 = arith.constant dense<0.000000e+00> : vector<5x5xf32>
    %133 = tpu.matmul %131, %132, %cst_106 {dimension_numbers = #tpu.dot_dimension_numbers<[1], [1], [0], [0], [0, 0, 1, 0], [], []>} : vector<5x16xbf16>, vector<5x16xbf16>, vector<5x5xf32> -> vector<5x5xf32>
    %cst_107 = arith.constant dense<0xFF800000> : vector<5xf32>
    %134 = vector.multi_reduction <maximumf>, %133, %cst_107 [1] : vector<5x5xf32> to vector<5xf32>
    %135 = vector.shape_cast %134 : vector<5xf32> to vector<5x1xf32>
    %136 = vector.broadcast %135 : vector<5x1xf32> to vector<5x5xf32>
    %137 = arith.subf %133, %136 : vector<5x5xf32>
    %138 = math.exp %137 : vector<5x5xf32>
    %cst_108 = arith.constant dense<0.000000e+00> : vector<5xf32>
    %139 = vector.multi_reduction <add>, %138, %cst_108 [1] : vector<5x5xf32> to vector<5xf32>
    %140 = vector.shape_cast %139 : vector<5xf32> to vector<5x1xf32>
    %141 = tpu.reciprocal %140 {approx = true} : vector<5x1xf32> -> vector<5x1xf32>
    %142 = vector.broadcast %141 : vector<5x1xf32> to vector<5x5xf32>
    %143 = arith.mulf %138, %142 : vector<5x5xf32>
    %144 = arith.truncf %143 : vector<5x5xf32> to vector<5x5xbf16>
    %145 = arith.truncf %130 : vector<5x16xf32> to vector<5x16xbf16>
    %cst_109 = arith.constant dense<0.000000e+00> : vector<5x16xf32>
    %146 = tpu.matmul %144, %145, %cst_109 {dimension_numbers = #tpu.dot_dimension_numbers<[1], [0], [0], [1], [0, 0, 1, 1], [], []>} : vector<5x5xbf16>, vector<5x16xbf16>, vector<5x16xf32> -> vector<5x16xf32>
    %147 = arith.truncf %146 : vector<5x16xf32> to vector<5x16xbf16>
    %c2_110 = arith.constant 2 : index
    %c0_111 = arith.constant 0 : index
    %c0_112 = arith.constant 0 : index
    %148 = vector.load %arg6[%c2_110, %c0_111, %c0_112] : memref<4x16x64xbf16, #tpu.memory_space<vmem>>, vector<1x16x64xbf16>
    %149 = vector.shape_cast %148 : vector<1x16x64xbf16> to vector<16x64xbf16>
    %cst_113 = arith.constant dense<0.000000e+00> : vector<5x64xf32>
    %150 = tpu.matmul %147, %149, %cst_113 {dimension_numbers = #tpu.dot_dimension_numbers<[1], [0], [0], [1], [0, 0, 1, 1], [], []>} : vector<5x16xbf16>, vector<16x64xbf16>, vector<5x64xf32> -> vector<5x64xf32>
    %151 = arith.addf %109, %150 : vector<5x64xf32>
    %c0_114 = arith.constant 0 : index
    %c3 = arith.constant 3 : index
    %c0_115 = arith.constant 0 : index
    %c0_116 = arith.constant 0 : index
    %152 = vector.load %arg4[%c0_114, %c3, %c0_115, %c0_116] : memref<3x4x64x16xbf16, #tpu.memory_space<vmem>>, vector<1x1x64x16xbf16>
    %153 = vector.shape_cast %152 : vector<1x1x64x16xbf16> to vector<64x16xbf16>
    %cst_117 = arith.constant dense<0.000000e+00> : vector<5x16xf32>
    %154 = tpu.matmul %24, %153, %cst_117 {dimension_numbers = #tpu.dot_dimension_numbers<[1], [0], [0], [1], [0, 0, 1, 1], [], []>} : vector<5x64xbf16>, vector<64x16xbf16>, vector<5x16xf32> -> vector<5x16xf32>
    %c0_118 = arith.constant 0 : index
    %c3_119 = arith.constant 3 : index
    %c0_120 = arith.constant 0 : index
    %c0_121 = arith.constant 0 : index
    %155 = vector.load %arg5[%c0_118, %c3_119, %c0_120, %c0_121] : memref<3x4x1x16xf32, #tpu.memory_space<vmem>>, vector<1x1x1x16xf32>
    %156 = vector.shape_cast %155 : vector<1x1x1x16xf32> to vector<1x16xf32>
    %157 = vector.broadcast %156 : vector<1x16xf32> to vector<5x16xf32>
    %158 = arith.addf %154, %157 : vector<5x16xf32>
    %c1_122 = arith.constant 1 : index
    %c3_123 = arith.constant 3 : index
    %c0_124 = arith.constant 0 : index
    %c0_125 = arith.constant 0 : index
    %159 = vector.load %arg4[%c1_122, %c3_123, %c0_124, %c0_125] : memref<3x4x64x16xbf16, #tpu.memory_space<vmem>>, vector<1x1x64x16xbf16>
    %160 = vector.shape_cast %159 : vector<1x1x64x16xbf16> to vector<64x16xbf16>
    %cst_126 = arith.constant dense<0.000000e+00> : vector<5x16xf32>
    %161 = tpu.matmul %24, %160, %cst_126 {dimension_numbers = #tpu.dot_dimension_numbers<[1], [0], [0], [1], [0, 0, 1, 1], [], []>} : vector<5x64xbf16>, vector<64x16xbf16>, vector<5x16xf32> -> vector<5x16xf32>
    %c1_127 = arith.constant 1 : index
    %c3_128 = arith.constant 3 : index
    %c0_129 = arith.constant 0 : index
    %c0_130 = arith.constant 0 : index
    %162 = vector.load %arg5[%c1_127, %c3_128, %c0_129, %c0_130] : memref<3x4x1x16xf32, #tpu.memory_space<vmem>>, vector<1x1x1x16xf32>
    %163 = vector.shape_cast %162 : vector<1x1x1x16xf32> to vector<1x16xf32>
    %164 = vector.broadcast %163 : vector<1x16xf32> to vector<5x16xf32>
    %165 = arith.addf %161, %164 : vector<5x16xf32>
    %c2_131 = arith.constant 2 : index
    %c3_132 = arith.constant 3 : index
    %c0_133 = arith.constant 0 : index
    %c0_134 = arith.constant 0 : index
    %166 = vector.load %arg4[%c2_131, %c3_132, %c0_133, %c0_134] : memref<3x4x64x16xbf16, #tpu.memory_space<vmem>>, vector<1x1x64x16xbf16>
    %167 = vector.shape_cast %166 : vector<1x1x64x16xbf16> to vector<64x16xbf16>
    %cst_135 = arith.constant dense<0.000000e+00> : vector<5x16xf32>
    %168 = tpu.matmul %24, %167, %cst_135 {dimension_numbers = #tpu.dot_dimension_numbers<[1], [0], [0], [1], [0, 0, 1, 1], [], []>} : vector<5x64xbf16>, vector<64x16xbf16>, vector<5x16xf32> -> vector<5x16xf32>
    %c2_136 = arith.constant 2 : index
    %c3_137 = arith.constant 3 : index
    %c0_138 = arith.constant 0 : index
    %c0_139 = arith.constant 0 : index
    %169 = vector.load %arg5[%c2_136, %c3_137, %c0_138, %c0_139] : memref<3x4x1x16xf32, #tpu.memory_space<vmem>>, vector<1x1x1x16xf32>
    %170 = vector.shape_cast %169 : vector<1x1x1x16xf32> to vector<1x16xf32>
    %171 = vector.broadcast %170 : vector<1x16xf32> to vector<5x16xf32>
    %172 = arith.addf %168, %171 : vector<5x16xf32>
    %173 = arith.truncf %158 : vector<5x16xf32> to vector<5x16xbf16>
    %174 = arith.truncf %165 : vector<5x16xf32> to vector<5x16xbf16>
    %cst_140 = arith.constant dense<0.000000e+00> : vector<5x5xf32>
    %175 = tpu.matmul %173, %174, %cst_140 {dimension_numbers = #tpu.dot_dimension_numbers<[1], [1], [0], [0], [0, 0, 1, 0], [], []>} : vector<5x16xbf16>, vector<5x16xbf16>, vector<5x5xf32> -> vector<5x5xf32>
    %cst_141 = arith.constant dense<0xFF800000> : vector<5xf32>
    %176 = vector.multi_reduction <maximumf>, %175, %cst_141 [1] : vector<5x5xf32> to vector<5xf32>
    %177 = vector.shape_cast %176 : vector<5xf32> to vector<5x1xf32>
    %178 = vector.broadcast %177 : vector<5x1xf32> to vector<5x5xf32>
    %179 = arith.subf %175, %178 : vector<5x5xf32>
    %180 = math.exp %179 : vector<5x5xf32>
    %cst_142 = arith.constant dense<0.000000e+00> : vector<5xf32>
    %181 = vector.multi_reduction <add>, %180, %cst_142 [1] : vector<5x5xf32> to vector<5xf32>
    %182 = vector.shape_cast %181 : vector<5xf32> to vector<5x1xf32>
    %183 = tpu.reciprocal %182 {approx = true} : vector<5x1xf32> -> vector<5x1xf32>
    %184 = vector.broadcast %183 : vector<5x1xf32> to vector<5x5xf32>
    %185 = arith.mulf %180, %184 : vector<5x5xf32>
    %186 = arith.truncf %185 : vector<5x5xf32> to vector<5x5xbf16>
    %187 = arith.truncf %172 : vector<5x16xf32> to vector<5x16xbf16>
    %cst_143 = arith.constant dense<0.000000e+00> : vector<5x16xf32>
    %188 = tpu.matmul %186, %187, %cst_143 {dimension_numbers = #tpu.dot_dimension_numbers<[1], [0], [0], [1], [0, 0, 1, 1], [], []>} : vector<5x5xbf16>, vector<5x16xbf16>, vector<5x16xf32> -> vector<5x16xf32>
    %189 = arith.truncf %188 : vector<5x16xf32> to vector<5x16xbf16>
    %c3_144 = arith.constant 3 : index
    %c0_145 = arith.constant 0 : index
    %c0_146 = arith.constant 0 : index
    %190 = vector.load %arg6[%c3_144, %c0_145, %c0_146] : memref<4x16x64xbf16, #tpu.memory_space<vmem>>, vector<1x16x64xbf16>
    %191 = vector.shape_cast %190 : vector<1x16x64xbf16> to vector<16x64xbf16>
    %cst_147 = arith.constant dense<0.000000e+00> : vector<5x64xf32>
    %192 = tpu.matmul %189, %191, %cst_147 {dimension_numbers = #tpu.dot_dimension_numbers<[1], [0], [0], [1], [0, 0, 1, 1], [], []>} : vector<5x16xbf16>, vector<16x64xbf16>, vector<5x64xf32> -> vector<5x64xf32>
    %193 = arith.addf %151, %192 : vector<5x64xf32>
    %194 = arith.addf %1, %193 : vector<5x64xf32>
    %c0_148 = arith.constant 0 : index
    %c0_149 = arith.constant 0 : index
    %195 = vector.load %arg7[%c0_148, %c0_149] : memref<1x64xf32, #tpu.memory_space<vmem>>, vector<1x64xf32>
    %196 = vector.broadcast %195 : vector<1x64xf32> to vector<5x64xf32>
    %197 = arith.addf %194, %196 : vector<5x64xf32>
    %c0_150 = arith.constant 0 : index
    %c0_151 = arith.constant 0 : index
    %198 = vector.load %arg8[%c0_150, %c0_151] : memref<1x64xf32, #tpu.memory_space<vmem>>, vector<1x64xf32>
    %c0_152 = arith.constant 0 : index
    %c0_153 = arith.constant 0 : index
    %199 = vector.load %arg9[%c0_152, %c0_153] : memref<1x64xf32, #tpu.memory_space<vmem>>, vector<1x64xf32>
    %cst_154 = arith.constant dense<0.000000e+00> : vector<5xf32>
    %200 = vector.multi_reduction <add>, %197, %cst_154 [1] : vector<5x64xf32> to vector<5xf32>
    %201 = vector.shape_cast %200 : vector<5xf32> to vector<5x1xf32>
    %cst_155 = arith.constant 6.400000e+01 : f32
    %202 = vector.broadcast %cst_155 : f32 to vector<5x1xf32>
    %203 = arith.divf %201, %202 : vector<5x1xf32>
    %204 = vector.broadcast %203 : vector<5x1xf32> to vector<5x64xf32>
    %205 = arith.subf %197, %204 : vector<5x64xf32>
    %206 = arith.mulf %205, %205 : vector<5x64xf32>
    %cst_156 = arith.constant dense<0.000000e+00> : vector<5xf32>
    %207 = vector.multi_reduction <add>, %206, %cst_156 [1] : vector<5x64xf32> to vector<5xf32>
    %208 = vector.shape_cast %207 : vector<5xf32> to vector<5x1xf32>
    %cst_157 = arith.constant 6.400000e+01 : f32
    %209 = vector.broadcast %cst_157 : f32 to vector<5x1xf32>
    %210 = arith.divf %208, %209 : vector<5x1xf32>
    %cst_158 = arith.constant 9.99999997E-7 : f32
    %211 = vector.broadcast %cst_158 : f32 to vector<5x1xf32>
    %212 = arith.addf %210, %211 : vector<5x1xf32>
    %213 = math.rsqrt %212 : vector<5x1xf32>
    %214 = vector.broadcast %213 : vector<5x1xf32> to vector<5x64xf32>
    %215 = arith.mulf %205, %214 : vector<5x64xf32>
    %216 = vector.broadcast %198 : vector<1x64xf32> to vector<5x64xf32>
    %217 = arith.mulf %215, %216 : vector<5x64xf32>
    %218 = vector.broadcast %199 : vector<1x64xf32> to vector<5x64xf32>
    %219 = arith.addf %217, %218 : vector<5x64xf32>
    %220 = arith.truncf %219 : vector<5x64xf32> to vector<5x64xbf16>
    %c0_159 = arith.constant 0 : index
    %c0_160 = arith.constant 0 : index
    %221 = vector.load %arg10[%c0_159, %c0_160] : memref<64x256xbf16, #tpu.memory_space<vmem>>, vector<64x256xbf16>
    %cst_161 = arith.constant dense<0.000000e+00> : vector<5x256xf32>
    %222 = tpu.matmul %220, %221, %cst_161 {dimension_numbers = #tpu.dot_dimension_numbers<[1], [0], [0], [1], [0, 0, 1, 1], [], []>} : vector<5x64xbf16>, vector<64x256xbf16>, vector<5x256xf32> -> vector<5x256xf32>
    %c0_162 = arith.constant 0 : index
    %c0_163 = arith.constant 0 : index
    %223 = vector.load %arg11[%c0_162, %c0_163] : memref<1x256xf32, #tpu.memory_space<vmem>>, vector<1x256xf32>
    %224 = vector.broadcast %223 : vector<1x256xf32> to vector<5x256xf32>
    %225 = arith.addf %222, %224 : vector<5x256xf32>
    %cst_164 = arith.constant 5.000000e-01 : f32
    %226 = vector.broadcast %cst_164 : f32 to vector<5x256xf32>
    %227 = arith.mulf %226, %225 : vector<5x256xf32>
    %cst_165 = arith.constant 0.707106769 : f32
    %228 = vector.broadcast %cst_165 : f32 to vector<5x256xf32>
    %229 = arith.mulf %225, %228 : vector<5x256xf32>
    %230 = math.erf %229 : vector<5x256xf32>
    %cst_166 = arith.constant 1.000000e+00 : f32
    %231 = vector.broadcast %cst_166 : f32 to vector<5x256xf32>
    %232 = arith.addf %231, %230 : vector<5x256xf32>
    %233 = arith.mulf %227, %232 : vector<5x256xf32>
    %234 = arith.truncf %233 : vector<5x256xf32> to vector<5x256xbf16>
    %c0_167 = arith.constant 0 : index
    %c0_168 = arith.constant 0 : index
    %235 = vector.load %arg12[%c0_167, %c0_168] : memref<256x64xbf16, #tpu.memory_space<vmem>>, vector<256x64xbf16>
    %cst_169 = arith.constant dense<0.000000e+00> : vector<5x64xf32>
    %236 = tpu.matmul %234, %235, %cst_169 {dimension_numbers = #tpu.dot_dimension_numbers<[1], [0], [0], [1], [0, 0, 1, 1], [], []>} : vector<5x256xbf16>, vector<256x64xbf16>, vector<5x64xf32> -> vector<5x64xf32>
    %c0_170 = arith.constant 0 : index
    %c0_171 = arith.constant 0 : index
    %237 = vector.load %arg13[%c0_170, %c0_171] : memref<1x64xf32, #tpu.memory_space<vmem>>, vector<1x64xf32>
    %238 = vector.broadcast %237 : vector<1x64xf32> to vector<5x64xf32>
    %239 = arith.addf %236, %238 : vector<5x64xf32>
    %240 = arith.addf %197, %239 : vector<5x64xf32>
    %c0_172 = arith.constant 0 : index
    %c0_173 = arith.constant 0 : index
    %c0_174 = arith.constant 0 : index
    %241 = vector.load %arg14[%c0_172, %c0_173, %c0_174] : memref<1x5x64xf32, #tpu.memory_space<vmem>>, vector<1x5x64xf32>
    %242 = vector.shape_cast %241 : vector<1x5x64xf32> to vector<5x64xf32>
    %243 = vector.shape_cast %240 : vector<5x64xf32> to vector<1x5x64xf32>
    tpu.vector_store %arg14[%c0_172, %c0_173, %c0_174], %243 {strides = array<i32>} : memref<1x5x64xf32, #tpu.memory_space<vmem>>, vector<1x5x64xf32>,
    return
  }
  func.func @transform_0(%arg0: i32) -> (i32, i32, i32) {
    %c0_i32 = arith.constant 0 : i32
    %c0_i32_0 = arith.constant 0 : i32
    %c0_i32_1 = arith.constant 0 : i32
    return %arg0, %c0_i32, %c0_i32_0 : i32, i32, i32
  }
  func.func @transform_1(%arg0: i32) -> (i32, i32) {
    %c0_i32 = arith.constant 0 : i32
    %c0_i32_0 = arith.constant 0 : i32
    %c0_i32_1 = arith.constant 0 : i32
    return %c0_i32, %c0_i32_0 : i32, i32
  }
  func.func @transform_2(%arg0: i32) -> (i32, i32) {
    %c0_i32 = arith.constant 0 : i32
    %c0_i32_0 = arith.constant 0 : i32
    %c0_i32_1 = arith.constant 0 : i32
    return %c0_i32, %c0_i32_0 : i32, i32
  }
  func.func @transform_3(%arg0: i32) -> (i32, i32, i32, i32) {
    %c0_i32 = arith.constant 0 : i32
    %c0_i32_0 = arith.constant 0 : i32
    %c0_i32_1 = arith.constant 0 : i32
    %c0_i32_2 = arith.constant 0 : i32
    %c0_i32_3 = arith.constant 0 : i32
    return %c0_i32, %c0_i32_0, %c0_i32_1, %c0_i32_2 : i32, i32, i32, i32
  }
  func.func @transform_4(%arg0: i32) -> (i32, i32, i32, i32) {
    %c0_i32 = arith.constant 0 : i32
    %c0_i32_0 = arith.constant 0 : i32
    %c0_i32_1 = arith.constant 0 : i32
    %c0_i32_2 = arith.constant 0 : i32
    %c0_i32_3 = arith.constant 0 : i32
    return %c0_i32, %c0_i32_0, %c0_i32_1, %c0_i32_2 : i32, i32, i32, i32
  }
  func.func @transform_5(%arg0: i32) -> (i32, i32, i32) {
    %c0_i32 = arith.constant 0 : i32
    %c0_i32_0 = arith.constant 0 : i32
    %c0_i32_1 = arith.constant 0 : i32
    %c0_i32_2 = arith.constant 0 : i32
    return %c0_i32, %c0_i32_0, %c0_i32_1 : i32, i32, i32
  }
  func.func @transform_6(%arg0: i32) -> (i32, i32) {
    %c0_i32 = arith.constant 0 : i32
    %c0_i32_0 = arith.constant 0 : i32
    %c0_i32_1 = arith.constant 0 : i32
    return %c0_i32, %c0_i32_0 : i32, i32
  }
  func.func @transform_7(%arg0: i32) -> (i32, i32) {
    %c0_i32 = arith.constant 0 : i32
    %c0_i32_0 = arith.constant 0 : i32
    %c0_i32_1 = arith.constant 0 : i32
    return %c0_i32, %c0_i32_0 : i32, i32
  }
  func.func @transform_8(%arg0: i32) -> (i32, i32) {
    %c0_i32 = arith.constant 0 : i32
    %c0_i32_0 = arith.constant 0 : i32
    %c0_i32_1 = arith.constant 0 : i32
    return %c0_i32, %c0_i32_0 : i32, i32
  }
  func.func @transform_9(%arg0: i32) -> (i32, i32) {
    %c0_i32 = arith.constant 0 : i32
    %c0_i32_0 = arith.constant 0 : i32
    %c0_i32_1 = arith.constant 0 : i32
    return %c0_i32, %c0_i32_0 : i32, i32
  }
  func.func @transform_10(%arg0: i32) -> (i32, i32) {
    %c0_i32 = arith.constant 0 : i32
    %c0_i32_0 = arith.constant 0 : i32
    %c0_i32_1 = arith.constant 0 : i32
    return %c0_i32, %c0_i32_0 : i32, i32
  }
  func.func @transform_11(%arg0: i32) -> (i32, i32) {
    %c0_i32 = arith.constant 0 : i32
    %c0_i32_0 = arith.constant 0 : i32
    %c0_i32_1 = arith.constant 0 : i32
    return %c0_i32, %c0_i32_0 : i32, i32
  }
  func.func @transform_12(%arg0: i32) -> (i32, i32) {
    %c0_i32 = arith.constant 0 : i32
    %c0_i32_0 = arith.constant 0 : i32
    %c0_i32_1 = arith.constant 0 : i32
    return %c0_i32, %c0_i32_0 : i32, i32
  }
  func.func @transform_13(%arg0: i32) -> (i32, i32, i32) {
    %c0_i32 = arith.constant 0 : i32
    %c0_i32_0 = arith.constant 0 : i32
    %c0_i32_1 = arith.constant 0 : i32
    return %arg0, %c0_i32, %c0_i32_0 : i32, i32, i32
  }
}

module attributes {stable_mosaic.version = 11 : i64} {
  func.func @_head_kernel(%arg0: i32, %arg1: memref<2x64xf32, #tpu.memory_space<vmem>>, %arg2: memref<1x64xf32, #tpu.memory_space<vmem>>, %arg3: memref<1x64xf32, #tpu.memory_space<vmem>>, %arg4: memref<64x128xbf16, #tpu.memory_space<vmem>>, %arg5: memref<1x128xf32, #tpu.memory_space<vmem>>, %arg6: memref<2x128xf32, #tpu.memory_space<vmem>>) attributes {dimension_semantics = [#tpu.dimension_semantics<parallel>], iteration_bounds = array<i64: 1>, scalar_prefetch = 0 : i64, scratch_operands = 0 : i64, tpu.core_type = #tpu.core_type<tc>, window_params = [{pipeline_mode = #tpu.pipeline_mode<synchronous>, transform_indices = @transform_0, window_bounds = array<i64: 2, 64>}, {pipeline_mode = #tpu.pipeline_mode<synchronous>, transform_indices = @transform_1, window_bounds = array<i64: 1, 64>}, {pipeline_mode = #tpu.pipeline_mode<synchronous>, transform_indices = @transform_2, window_bounds = array<i64: 1, 64>}, {pipeline_mode = #tpu.pipeline_mode<synchronous>, transform_indices = @transform_3, window_bounds = array<i64: 64, 128>}, {pipeline_mode = #tpu.pipeline_mode<synchronous>, transform_indices = @transform_4, window_bounds = array<i64: 1, 128>}, {pipeline_mode = #tpu.pipeline_mode<synchronous>, transform_indices = @transform_5, window_bounds = array<i64: 2, 128>}]} {
    %c0 = arith.constant 0 : index
    %c0_0 = arith.constant 0 : index
    %0 = vector.load %arg1[%c0, %c0_0] : memref<2x64xf32, #tpu.memory_space<vmem>>, vector<2x64xf32>
    %c0_1 = arith.constant 0 : index
    %c0_2 = arith.constant 0 : index
    %1 = vector.load %arg2[%c0_1, %c0_2] : memref<1x64xf32, #tpu.memory_space<vmem>>, vector<1x64xf32>
    %c0_3 = arith.constant 0 : index
    %c0_4 = arith.constant 0 : index
    %2 = vector.load %arg3[%c0_3, %c0_4] : memref<1x64xf32, #tpu.memory_space<vmem>>, vector<1x64xf32>
    %cst = arith.constant dense<0.000000e+00> : vector<2xf32>
    %3 = vector.multi_reduction <add>, %0, %cst [1] : vector<2x64xf32> to vector<2xf32>
    %4 = vector.shape_cast %3 : vector<2xf32> to vector<2x1xf32>
    %cst_5 = arith.constant 6.400000e+01 : f32
    %5 = vector.broadcast %cst_5 : f32 to vector<2x1xf32>
    %6 = arith.divf %4, %5 : vector<2x1xf32>
    %7 = vector.broadcast %6 : vector<2x1xf32> to vector<2x64xf32>
    %8 = arith.subf %0, %7 : vector<2x64xf32>
    %9 = arith.mulf %8, %8 : vector<2x64xf32>
    %cst_6 = arith.constant dense<0.000000e+00> : vector<2xf32>
    %10 = vector.multi_reduction <add>, %9, %cst_6 [1] : vector<2x64xf32> to vector<2xf32>
    %11 = vector.shape_cast %10 : vector<2xf32> to vector<2x1xf32>
    %cst_7 = arith.constant 6.400000e+01 : f32
    %12 = vector.broadcast %cst_7 : f32 to vector<2x1xf32>
    %13 = arith.divf %11, %12 : vector<2x1xf32>
    %cst_8 = arith.constant 9.99999997E-7 : f32
    %14 = vector.broadcast %cst_8 : f32 to vector<2x1xf32>
    %15 = arith.addf %13, %14 : vector<2x1xf32>
    %16 = math.rsqrt %15 : vector<2x1xf32>
    %17 = vector.broadcast %16 : vector<2x1xf32> to vector<2x64xf32>
    %18 = arith.mulf %8, %17 : vector<2x64xf32>
    %19 = vector.broadcast %1 : vector<1x64xf32> to vector<2x64xf32>
    %20 = arith.mulf %18, %19 : vector<2x64xf32>
    %21 = vector.broadcast %2 : vector<1x64xf32> to vector<2x64xf32>
    %22 = arith.addf %20, %21 : vector<2x64xf32>
    %23 = arith.truncf %22 : vector<2x64xf32> to vector<2x64xbf16>
    %c0_9 = arith.constant 0 : index
    %c0_10 = arith.constant 0 : index
    %24 = vector.load %arg4[%c0_9, %c0_10] : memref<64x128xbf16, #tpu.memory_space<vmem>>, vector<64x128xbf16>
    %cst_11 = arith.constant dense<0.000000e+00> : vector<2x128xf32>
    %25 = tpu.matmul %23, %24, %cst_11 {dimension_numbers = #tpu.dot_dimension_numbers<[1], [0], [0], [1], [0, 0, 1, 1], [], []>} : vector<2x64xbf16>, vector<64x128xbf16>, vector<2x128xf32> -> vector<2x128xf32>
    %c0_12 = arith.constant 0 : index
    %c0_13 = arith.constant 0 : index
    %26 = vector.load %arg5[%c0_12, %c0_13] : memref<1x128xf32, #tpu.memory_space<vmem>>, vector<1x128xf32>
    %27 = vector.broadcast %26 : vector<1x128xf32> to vector<2x128xf32>
    %28 = arith.addf %25, %27 : vector<2x128xf32>
    %c0_14 = arith.constant 0 : index
    %c0_15 = arith.constant 0 : index
    %29 = vector.load %arg6[%c0_14, %c0_15] : memref<2x128xf32, #tpu.memory_space<vmem>>, vector<2x128xf32>
    tpu.vector_store %arg6[%c0_14, %c0_15], %28 {strides = array<i32>} : memref<2x128xf32, #tpu.memory_space<vmem>>, vector<2x128xf32>,
    return
  }
  func.func @transform_0(%arg0: i32) -> (i32, i32) {
    %c0_i32 = arith.constant 0 : i32
    %c0_i32_0 = arith.constant 0 : i32
    %c0_i32_1 = arith.constant 0 : i32
    return %c0_i32, %c0_i32_0 : i32, i32
  }
  func.func @transform_1(%arg0: i32) -> (i32, i32) {
    %c0_i32 = arith.constant 0 : i32
    %c0_i32_0 = arith.constant 0 : i32
    %c0_i32_1 = arith.constant 0 : i32
    return %c0_i32, %c0_i32_0 : i32, i32
  }
  func.func @transform_2(%arg0: i32) -> (i32, i32) {
    %c0_i32 = arith.constant 0 : i32
    %c0_i32_0 = arith.constant 0 : i32
    %c0_i32_1 = arith.constant 0 : i32
    return %c0_i32, %c0_i32_0 : i32, i32
  }
  func.func @transform_3(%arg0: i32) -> (i32, i32) {
    %c0_i32 = arith.constant 0 : i32
    %c0_i32_0 = arith.constant 0 : i32
    %c0_i32_1 = arith.constant 0 : i32
    return %c0_i32, %c0_i32_0 : i32, i32
  }
  func.func @transform_4(%arg0: i32) -> (i32, i32) {
    %c0_i32 = arith.constant 0 : i32
    %c0_i32_0 = arith.constant 0 : i32
    %c0_i32_1 = arith.constant 0 : i32
    return %c0_i32, %c0_i32_0 : i32, i32
  }
  func.func @transform_5(%arg0: i32) -> (i32, i32) {
    %c0_i32 = arith.constant 0 : i32
    %c0_i32_0 = arith.constant 0 : i32
    %c0_i32_1 = arith.constant 0 : i32
    return %c0_i32, %c0_i32_0 : i32, i32
  }
}

</mosaic_0001>

<bundles_post_ra>
// kernel: deit_forward.7
= control target key start
LH: loop header
LB: loop body
LE: loop exit
PB: predicated region body
PF: predicated region fallthrough
CT: control target
= control target key end

     0   :  { %vm25_vm0 = vcmask 517120   ;;  %s269_s0 = inlined_call_operand.vmem [shape: f32[2,64], index: 0, kind: input, shape index: {}]   ;;  %s270_s1 = inlined_call_operand.vmem [shape: f32[1,64], index: 1, kind: input, shape index: {}]   ;;  %s271_s2 = inlined_call_operand.vmem [shape: f32[1,64], index: 2, kind: input, shape index: {}]   ;;  %s272_s3 = inlined_call_operand.vmem [shape: bf16[64,128], index: 3, kind: input, shape index: {}]   ;;  %s273_s4 = inlined_call_operand.vmem [shape: f32[1,128], index: 4, kind: input, shape index: {}]   ;;  %s274_s5 = inlined_call_operand.hbm [shape: f32[2,128], index: 5, kind: output, shape index: {}]  }
   0x1   :  { %v22_v0 = vld [vmem:[%s269_s0] sm:$0x3] }
   0x2   :  { %v26_v1 = vsel %vm25_vm0, %v22_v0, 0.0 }
   0x3   :  { %27 = vadd.xlane.f32.xlu0 %v26_v1 }
   0x4   :  { %10 = vsyncpa [#allocation3], 0  ;;  %v181_v7 = vld [vmem:[%s272_s3 + $0x18] sm:$0xff]   ;;  %v209_v8 = vmov 0.0   ;;  %vm210_vm1 = vmmov 0   ;;  %v182_v9 = vld [vmem:[%s272_s3 + $0x10] sm:$0xff]  }
   0x5   :  { %166 = vmatprep.subr.bf16.mxu0 %v209_v8  ;;  %174 = vmatprep.mubr.msk.bf16.mxu0 %vm210_vm1, %v209_v8  ;;  %v183_v10 = vld [vmem:[%s272_s3 + $0x8] sm:$0xff]   ;;  %v184_v11 = vld [vmem:[%s272_s3] sm:$0xff]   ;;  %vm94_vm2 = vcmask 523264   ;;  %s211_s7 = smov [#allocation2]  }
   0x6   :  { %167 = vmatpush3.bf16.msra.mxu0 %v181_v7  ;;  %v153_v16 = vld [vmem:[%s270_s1] ss:$0 sm:$0xff]  ;;  %s145_s8 = sshll.u32 %s211_s7, 4  ;;  %s146_s8 = int_to_ptr.vmem [resolvable:$true] %s145_s8 }
   0x7   :  { %168 = vmatprep.subr.bf16.mxu0 %v209_v8  ;;  %v154_v18 = vld [vmem:[%s271_s2] ss:$0 sm:$0xff]  ;;  %s187_s1 = scalar_lea.vmem %s146_s8, 32  ;;  %p192_p1 = scmp.lt.s32.totalorder %s146_s8, %s146_s8 }
   0x8   :  { %v155_v22 = vld [vmem:[%s273_s4] ss:$0 sm:$0xff]  ;;  %p188_p0 = scmp.ne.s32.totalorder %s146_s8, %s187_s1  ;;  %p193_p2 = scmp.lt.s32.totalorder %s187_s1, %s187_s1 }
   0xa   :  { %169 = vmatpush3.bf16.msra.mxu0 %v182_v9  ;;  %p194_p3 = por %p193_p2, %p192_p1 }
   0xb   :  { %170 = vmatprep.subr.bf16.mxu0 %v209_v8 }
   0xc   :  { %p195_p4 = pnand %p194_p3, %p188_p0 }
   0xe   :  { %171 = vmatpush3.bf16.msra.mxu0 %v183_v10 }
   0xf   :  { %172 = vmatprep.subr.bf16.mxu0 %v209_v8 }
  0x12   :  { %173 = vmatpush3.bf16.msra.mxu0 %v184_v11 }
  0x8c   :  { %v28_v2 = vpop.xlane.xlu0 %27 }
  0x8d   :  { %v30_v3 = vmul.f32 0.015625, %v28_v2 }
  0x8f   :  { %v31_v4 = vsub.f32 %v22_v0, %v30_v3 }
  0x91   :  { %v32_v5 = vmul.f32 %v31_v4, %v31_v4 }
  0x93   :  { %v33_v6 = vsel %vm25_vm0, %v32_v5, 0.0 }
  0x94   :  { %34 = vadd.xlane.f32.xlu0 %v33_v6 }
 0x11d   :  { %v35_v12 = vpop.xlane.xlu0 %34 }
 0x11e   :  { %v36_v13 = vmul.f32 0.015625, %v35_v12 }
 0x120   :  { %v37_v14 = vadd.f32 1e-06, %v36_v13 }
 0x122   :  { %185 = vrsqrt.f32 %v37_v14 }
 0x12f   :  { %v186_v15 = vpop.eup %185 }
 0x130   :  { %v39_v17 = vmul.f32 %v186_v15, %v31_v4 }
 0x132   :  { %v46_v19 = vmul.f32 %v153_v16, %v39_v17 }
 0x134   :  { %v53_v20 = vadd.f32 %v154_v18, %v46_v19 }
 0x136   :  { %v54_v21 = vpack.c.bf16 %v53_v20, %v53_v20 }
 0x138   :  { %175 = vmatmul.mubr.msk.bf16.vlgmr.msra.gmra.mxu0 %vm94_vm2, %v54_v21 }
 0x1f8   :  { %v132_v23 = vpop.f32.mrf.mxu0 }
 0x1f9   :  { %v133_v24 = vadd.f32 %v155_v22, %v132_v23 }
 0x1fa   :  { %v176_v25 = vpop.f32.mrf.mxu0 }
 0x1fb   :  { %138 = vst [vmem:[#allocation2] sm:$0x3] %v133_v24 }
 0x1fc   :  { %v135_v26 = vpop.f32.mrf.mxu0 }
 0x1fd   :  { %198 = shalt.err (!%p195_p4)
}
 0x1fe   :  { %148 = dma.vmem_to_hbm [thread:$0]  %s146_s8, 32, %s274_s5, [#allocation3]   ;;  %v177_v27 = vpop.f32.mrf.mxu0 }
 0x1ff   :  { %207 = dma.done.wait [#allocation3], 32  }
 0x200   :  { %208 = vsyncadd [#allocation3], 4294967264 }
 0x201   :  { %152 = vsyncpa [#allocation3], 1 }

// kernel: deit_forward.4
= control target key start
LH: loop header
LB: loop body
LE: loop exit
PB: predicated region body
PF: predicated region fallthrough
CT: control target
= control target key end

     0   :  { %s1037_s18 = smov 0   ;;  %s1223_s0 = inlined_call_operand.vmem [shape: f32[2,4,768], index: 0, kind: input, shape index: {}]   ;;  %s1224_s1 = inlined_call_operand.vmem [shape: bf16[768,64], index: 1, kind: input, shape index: {}]   ;;  %s1225_s2 = inlined_call_operand.vmem [shape: f32[1,64], index: 2, kind: input, shape index: {}]   ;;  %s1226_s3 = inlined_call_operand.vmem [shape: f32[1,64], index: 3, kind: input, shape index: {}]   ;;  %s1227_s4 = inlined_call_operand.vmem [shape: f32[5,64], index: 4, kind: input, shape index: {}]   ;;  %s1228_s5 = inlined_call_operand.vmem [shape: f32[2,5,64], index: 5, kind: output, shape index: {}]  }
   0x1 LB: > { %s815_s19 = sadd.s32 4294967295, %s1005_s18   ;;  %p819_p0 = scmp.ge.s32.totalorder %s1005_s18, 1  ;;  %s1005_s18 = sphi %s1037_s18, %s15_s18  }
   0x2   : > { %p187_p1 = scmp.lt.s32.totalorder %s1005_s18, 3 }
   0x4   : > { %p188_p2 = pnand %p819_p0, %p187_p1 }
   0x5   : > { %p214_p3 = scmp.lt.s32.totalorder (!%p188_p2), %s815_s19, 1 }
   0x6   : > { %191 = sbr.rel (%p188_p2) target bundleno = 278 (0x116), region = 40 }
   0xb   : > { %v948_v0 = vld [vmem:[%s1224_s1 + $0x78] sm:$0xff]   ;;  %v952_v4 = vld [vmem:[%s1224_s1 + $0x70] sm:$0xff]   ;;  %v956_v8 = vld [vmem:[%s1224_s1 + $0x68] sm:$0xff]   ;;  %s1230_s19 = smov (!%p214_p3, %s815_s19), 1  ;;  %vm756_vm0 = vcmask 516096   ;;  %vm760_vm1 = vcmask 519168  }
   0xc   : > { %v949_v1 = vld [vmem:[%s1224_s1 + $0x38] sm:$0xff]   ;;  %873 = vmatprep.subr.bf16.mxu0 %v948_v0  ;;  %v953_v5 = vld [vmem:[%s1224_s1 + $0x30] sm:$0xff]   ;;  %v957_v9 = vld [vmem:[%s1224_s1 + $0x28] sm:$0xff]   ;;  %s939_s24 = smul.u32 24, %s1230_s19  ;;  %s821_s11 = sshll.u32 %s1230_s19, 3 }
   0xd   : > { %v950_v2 = vld [vmem:[%s1224_s1 + $0xf8] sm:$0xff]   ;;  %874 = vmatpush3.bf16.msra.mxu0 %v949_v1  ;;  %v954_v6 = vld [vmem:[%s1224_s1 + $0xf0] sm:$0xff]   ;;  %v958_v10 = vld [vmem:[%s1224_s1 + $0xe8] sm:$0xff]   ;;  %s1150_s20 = scalar_lea.vmem %s1228_s5, %s821_s11 }
   0xe   : > { %v951_v3 = vld [vmem:[%s1224_s1 + $0xb8] sm:$0xff]   ;;  %895 = vmatprep.subr.bf16.mxu1 %v950_v2  ;;  %875 = vmatprep.subr.bf16.mxu0 %v952_v4  ;;  %v955_v7 = vld [vmem:[%s1224_s1 + $0xb0] sm:$0xff]   ;;  %v959_v11 = vld [vmem:[%s1224_s1 + $0xa8] sm:$0xff]   ;;  %s1139_s10 = scalar_lea.vmem %s1223_s0, %s939_s24 }
   0xf   : > { %896 = vmatpush3.bf16.msra.mxu1 %v951_v3  ;;  %v960_v12 = vld [vmem:[%s1224_s1 + $0x60] sm:$0xff]   ;;  %v964_v16 = vld [vmem:[%s1224_s1 + $0x58] sm:$0xff]   ;;  %v968_v20 = vld [vmem:[%s1224_s1 + $0x50] sm:$0xff]  }
  0x10   : > { %897 = vmatprep.subr.bf16.mxu1 %v954_v6  ;;  %v961_v13 = vld [vmem:[%s1224_s1 + $0x20] sm:$0xff]   ;;  %v965_v17 = vld [vmem:[%s1224_s1 + $0x18] sm:$0xff]   ;;  %v969_v21 = vld [vmem:[%s1224_s1 + $0x10] sm:$0xff]  }
  0x11   : > { %876 = vmatpush3.bf16.msra.mxu0 %v953_v5  ;;  %v962_v14 = vld [vmem:[%s1224_s1 + $0xe0] sm:$0xff]   ;;  %v966_v18 = vld [vmem:[%s1224_s1 + $0xd8] sm:$0xff]   ;;  %v970_v22 = vld [vmem:[%s1224_s1 + $0xd0] sm:$0xff]  }
  0x12   : > { %877 = vmatprep.subr.bf16.mxu0 %v956_v8  ;;  %v963_v15 = vld [vmem:[%s1224_s1 + $0xa0] sm:$0xff]   ;;  %v967_v19 = vld [vmem:[%s1224_s1 + $0x98] sm:$0xff]   ;;  %v971_v23 = vld [vmem:[%s1224_s1 + $0x90] sm:$0xff]  }
  0x13   : > { %898 = vmatpush3.bf16.msra.mxu1 %v955_v7  ;;  %v972_v24 = vld [vmem:[%s1224_s1 + $0x48] sm:$0xff]   ;;  %v976_v28 = vld [vmem:[%s1224_s1 + $0x40] sm:$0xff]   ;;  %v981_v38 = vld [vmem:[%s1224_s1 + $0x178] sm:$0xff]  }
  0x14   : > { %899 = vmatprep.subr.bf16.mxu1 %v958_v10  ;;  %v973_v25 = vld [vmem:[%s1224_s1 + $0x8] sm:$0xff]   ;;  %v977_v29 = vld [vmem:[%s1224_s1] sm:$0xff]   ;;  %v983_v42 = vld [vmem:[%s1224_s1 + $0x138] sm:$0xff]  }
  0x15   : > { %878 = vmatpush3.bf16.msra.mxu0 %v957_v9  ;;  %v974_v26 = vld [vmem:[%s1224_s1 + $0xc8] sm:$0xff]   ;;  %v978_v30 = vld [vmem:[%s1224_s1 + $0xc0] sm:$0xff]   ;;  %v984_v44 = vld [vmem:[%s1224_s1 + $0x170] sm:$0xff]  }
  0x16   : > { %879 = vmatprep.subr.bf16.mxu0 %v960_v12  ;;  %v975_v27 = vld [vmem:[%s1224_s1 + $0x88] sm:$0xff]   ;;  %v224_v31 = vld [vmem:[%s1139_s10] sm:$0xff]  ;;  %v985_v46 = vld [vmem:[%s1224_s1 + $0x130] sm:$0xff]  }
  0x17   : > { %900 = vmatpush3.bf16.msra.mxu1 %v959_v11  ;;  %v753_v32 = vld [vmem:[%s1226_s3] sm:$0x1]  ;;  %v230_v34 = vcombine.high %v224_v31, %v224_v31  ;;  %v236_v37 = vpack.c.bf16 %v224_v31, %v224_v31  ;;  %v225_v40 = vld [vmem:[%s1139_s10 + $0x8] sm:$0xff]  ;;  %v990_v51 = vld [vmem:[%s1224_s1 + $0x158] sm:$0xff]  }
  0x18   : > { %901 = vmatprep.subr.bf16.mxu1 %v962_v14  ;;  %v754_v33 = vld [vmem:[%s1227_s4] sm:$0x1]  ;;  %v231_v41 = vcombine.high %v225_v40, %v225_v40  ;;  %v238_v43 = vpack.c.bf16 %v225_v40, %v225_v40  ;;  %v986_v47 = vld [vmem:[%s1224_s1 + $0x168] sm:$0xff]   ;;  %v226_v52 = vld [vmem:[%s1139_s10 + $0x10] sm:$0xff] }
  0x19   : > { %880 = vmatpush3.bf16.msra.mxu0 %v961_v13  ;;  %v755_v35 = vadd.f32 %v754_v33, %v753_v32  ;;  %v980_v36 = vld [vmem:[%s1224_s1 + $0x80] sm:$0xff]   ;;  %v237_v39 = vpack.c.bf16 %v230_v34, %v230_v34  ;;  %v987_v48 = vld [vmem:[%s1224_s1 + $0x128] sm:$0xff]   ;;  %v991_v53 = vld [vmem:[%s1224_s1 + $0x118] sm:$0xff]   ;;  %v232_v54 = vcombine.high %v226_v52, %v226_v52  ;;  %v240_v62 = vpack.c.bf16 %v226_v52, %v226_v52 }
  0x1a   : > { %881 = vmatprep.subr.bf16.mxu0 %v964_v16  ;;  %v239_v45 = vpack.c.bf16 %v231_v41, %v231_v41  ;;  %v988_v49 = vld [vmem:[%s1224_s1 + $0x160] sm:$0xff]   ;;  %v992_v55 = vld [vmem:[%s1224_s1 + $0x150] sm:$0xff]   ;;  %v994_v58 = vld [vmem:[%s1224_s1 + $0x148] sm:$0xff]  }
  0x1b   : > { %902 = vmatpush3.bf16.msra.mxu1 %v963_v15  ;;  %757 = vst.msk [vmem:[%s1150_s20] sm:$0x1] %vm756_vm0, %v755_v35  ;;  %665 = vmatprep.mubr.bf16.mxu0 %v237_v39  ;;  %v989_v50 = vld [vmem:[%s1224_s1 + $0x120] sm:$0xff]   ;;  %v241_v56 = vpack.c.bf16 %v232_v54, %v232_v54  ;;  %v993_v57 = vld [vmem:[%s1224_s1 + $0x110] sm:$0xff]   ;;  %v995_v59 = vld [vmem:[%s1224_s1 + $0x108] sm:$0xff]  }
  0x1c   : > { %903 = vmatprep.subr.bf16.mxu1 %v966_v18  ;;  %705 = vmatprep.mubr.bf16.mxu1 %v239_v45  ;;  %v996_v60 = vld [vmem:[%s1224_s1 + $0x140] sm:$0xff]  }
  0x1d   : > { %882 = vmatpush3.bf16.msra.mxu0 %v965_v17  ;;  %v997_v61 = vld [vmem:[%s1224_s1 + $0x100] sm:$0xff]  }
  0x1e   : > { %883 = vmatprep.subr.bf16.mxu0 %v968_v20  ;;  %v822_v8 = vld [vmem:[%s1225_s2] ss:$0 sm:$0xff]  ;;  %v758_v15 = vld [vmem:[%s1227_s4 + $0x1] sm:$0xf] }
  0x1f   : > { %904 = vmatpush3.bf16.msra.mxu1 %v967_v19 }
  0x20   : > { %905 = vmatprep.subr.bf16.mxu1 %v970_v22 }
  0x21   : > { %884 = vmatpush3.bf16.msra.mxu0 %v969_v21 }
  0x22   : > { %885 = vmatprep.subr.bf16.mxu0 %v972_v24 }
  0x23   : > { %906 = vmatpush3.bf16.msra.mxu1 %v971_v23 }
  0x24   : > { %907 = vmatprep.subr.bf16.mxu1 %v974_v26 }
  0x25   : > { %886 = vmatpush3.bf16.msra.mxu0 %v973_v25 }
  0x26   : > { %887 = vmatprep.subr.bf16.mxu0 %v976_v28 }
  0x27   : > { %908 = vmatpush3.bf16.msra.mxu1 %v975_v27 }
  0x28   : > { %909 = vmatprep.subr.bf16.mxu1 %v978_v30 }
  0x29   : > { %888 = vmatpush3.bf16.msra.mxu0 %v977_v29 }
  0x2a   : > { %917 = vmatprep.subr.bf16.mxu0 %v981_v38 }
  0x2b   : > { %910 = vmatpush3.bf16.msra.mxu1 %v980_v36 }
  0x2c   : > { %666 = vmatmul.mubr.bf16.vlgmr.msra.gmra.mxu0 %v236_v37 }
  0x2d   : > { %918 = vmatpush3.bf16.msra.mxu0 %v983_v42  ;;  %745 = vmatprep.mubr.bf16.mxu0 %v241_v56 }
  0x2e   : > { %919 = vmatprep.subr.bf16.mxu0 %v984_v44  ;;  %706 = vmatmul.mubr.bf16.vlgmr.msra.gmra.mxu1 %v238_v43 }
  0x31   : > { %920 = vmatpush3.bf16.msra.mxu0 %v985_v46 }
  0x32   : > { %921 = vmatprep.subr.bf16.mxu0 %v986_v47 }
  0x35   : > { %922 = vmatpush3.bf16.msra.mxu0 %v987_v48 }
  0x36   : > { %923 = vmatprep.subr.bf16.mxu0 %v988_v49 }
  0x39   : > { %924 = vmatpush3.bf16.msra.mxu0 %v989_v50 }
  0x3a   : > { %925 = vmatprep.subr.bf16.mxu0 %v990_v51 }
  0x3d   : > { %926 = vmatpush3.bf16.msra.mxu0 %v991_v53 }
  0x3e   : > { %927 = vmatprep.subr.bf16.mxu0 %v992_v55 }
  0x41   : > { %928 = vmatpush3.bf16.msra.mxu0 %v993_v57 }
  0x42   : > { %929 = vmatprep.subr.bf16.mxu0 %v994_v58 }
  0x45   : > { %930 = vmatpush3.bf16.msra.mxu0 %v995_v59 }
  0x46   : > { %931 = vmatprep.subr.bf16.mxu0 %v996_v60 }
  0x49   : > { %932 = vmatpush3.bf16.msra.mxu0 %v997_v61 }
  0x4c   : > { %746 = vmatmul.mubr.bf16.vlgmr.msra.gmra.mxu0 %v240_v62 }
  0xec   : > { %v889_v63 = vpop.f32.mrf.mxu0 }
  0xee   : > { %v890_v0 = vpop.f32.mrf.mxu0  ;;  %v911_v1 = vpop.f32.mrf.mxu1 }
  0xef   : > { %v891_v7 = vadd.f32 %v890_v0, %v889_v63 }
  0xf0   : > { %v892_v2 = vpop.f32.mrf.mxu0  ;;  %v912_v3 = vpop.f32.mrf.mxu1 }
  0xf1   : > { %v668_v9 = vadd.f32 %v891_v7, %v822_v8  ;;  %v913_v10 = vadd.f32 %v912_v3, %v911_v1 }
  0xf2   : > { %v893_v4 = vpop.f32.mrf.mxu0  ;;  %v914_v5 = vpop.f32.mrf.mxu1 }
  0xf3   : > { %v708_v13 = vadd.f32 %v913_v10, %v668_v9 }
  0xf4   : > { %v915_v6 = vpop.f32.mrf.mxu1 }
 0x10c   : > { %v933_v11 = vpop.f32.mrf.mxu0 }
 0x10e   : > { %v934_v12 = vpop.f32.mrf.mxu0 }
 0x10f   : > { %v935_v14 = vadd.f32 %v934_v12, %v933_v11 }
 0x110   : > { %v936_v16 = vpop.f32.mrf.mxu0 }
 0x111   : > { %v748_v17 = vadd.f32 %v935_v14, %v708_v13 }
 0x112   : > { %v937_v18 = vpop.f32.mrf.mxu0 }
 0x113   : > { %v759_v19 = vadd.f32 %v758_v15, %v748_v17 }
 0x115   : > { %761 = vst.msk [vmem:[%s1150_s20 + $0x1] sm:$0xf] %vm760_vm1, %v759_v19 }
 0x116 PF: > { %s15_s18 = sadd.s32 1, %s1005_s18  }
 0x117   : > { %p12_p4 = scmp.ge.s32.totalorder %s15_s18, 4  }
 0x119   :  { %14 = sbr.rel (!%p12_p4) target bundleno = 1 (0x1), region = 70 }

// kernel: deit_forward.5
= control target key start
LH: loop header
LB: loop body
LE: loop exit
PB: predicated region body
PF: predicated region fallthrough
CT: control target
= control target key end

     0   :  { %s3231_s25 = smov 0   ;;  %s3725_s0 = inlined_call_operand.vmem [shape: f32[2,5,64], index: 0, kind: input, shape index: {}]   ;;  %s3726_s1 = inlined_call_operand.vmem [shape: f32[1,64], index: 1, kind: input, shape index: {}]   ;;  %s3727_s2 = inlined_call_operand.vmem [shape: f32[1,64], index: 2, kind: input, shape index: {}]   ;;  %s3728_s3 = inlined_call_operand.vmem [shape: bf16[3,4,64,16], index: 3, kind: input, shape index: {}]   ;;  %s3729_s4 = inlined_call_operand.vmem [shape: f32[3,4,1,16], index: 4, kind: input, shape index: {}]   ;;  %s3730_s5 = inlined_call_operand.vmem [shape: bf16[4,16,64], index: 5, kind: input, shape index: {}]   ;;  %s3731_s6 = inlined_call_operand.vmem [shape: f32[1,64], index: 6, kind: input, shape index: {}]   ;;  %s3732_s7 = inlined_call_operand.vmem [shape: f32[1,64], index: 7, kind: input, shape index: {}]   ;;  %s3733_s8 = inlined_call_operand.vmem [shape: f32[1,64], index: 8, kind: input, shape index: {}]   ;;  %s3734_s9 = inlined_call_operand.vmem [shape: bf16[64,256], index: 9, kind: input, shape index: {}]   ;;  %s3735_s10 = inlined_call_operand.vmem [shape: f32[1,256], index: 10, kind: input, shape index: {}]   ;;  %s3736_s11 = inlined_call_operand.vmem [shape: bf16[256,64], index: 11, kind: input, shape index: {}]   ;;  %s3737_s12 = inlined_call_operand.vmem [shape: f32[1,64], index: 12, kind: input, shape index: {}]   ;;  %s3738_s13 = inlined_call_operand.vmem [shape: f32[2,5,64], index: 13, kind: output, shape index: {}]  }
   0x1 LB: > { %s2477_s26 = sadd.s32 4294967295, %s3155_s25   ;;  %p2481_p0 = scmp.ge.s32.totalorder %s3155_s25, 1  ;;  %s3155_s25 = sphi %s3231_s25, %s23_s25  }
   0x2   : > { %p386_p1 = scmp.lt.s32.totalorder %s3155_s25, 3 }
   0x4   : > { %p387_p2 = pnand %p2481_p0, %p386_p1 }
   0x5   : > { %p428_p3 = scmp.lt.s32.totalorder (!%p387_p2), %s2477_s26, 1 }
   0x6   : > { %390 = sbr.rel (%p387_p2) target bundleno = 4729 (0x1279), region = 72 }
   0xb   : > { %vm440_vm0 = vcmask 520192   ;;  %s3740_s26 = smov (!%p428_p3, %s2477_s26), 1  ;;  %v3044_v7 = vld [vmem:[%s3728_s3 + $0x18] sm:$0xff]   ;;  %v3157_v8 = vmov 0.0   ;;  %v3046_v10 = vld [vmem:[%s3728_s3 + $0x10] sm:$0xff]   ;;  %v3048_v12 = vld [vmem:[%s3728_s3 + $0x8] sm:$0xff]  }
   0xc   : > { %s2482_s27 = sshll.u32 %s3740_s26, 3  ;;  %2816 = vmatprep.subr.bf16.mxu0 %v3157_v8  ;;  %2828 = vmatprep.subr.bf16.mxu1 %v3157_v8  ;;  %v3045_v9 = vld [vmem:[%s3728_s3 + $0x98] sm:$0xff]   ;;  %v3047_v11 = vld [vmem:[%s3728_s3 + $0x90] sm:$0xff]   ;;  %v3049_v13 = vld [vmem:[%s3728_s3 + $0x88] sm:$0xff]   ;;  %vm3158_vm1 = vmmov 0   ;;  %vm509_vm2 = vcmask 523264  }
   0xd   : > { %s3247_s30 = scalar_lea.vmem %s3725_s0, %s2482_s27  ;;  %2817 = vmatpush3.bf16.msra.mxu0 %v3044_v7  ;;  %2829 = vmatpush3.bf16.msra.mxu1 %v3045_v9  ;;  %v3050_v14 = vld [vmem:[%s3728_s3] sm:$0xff]   ;;  %v3052_v25 = vld [vmem:[%s3728_s3 + $0x118] sm:$0xff]   ;;  %v3053_v27 = vld [vmem:[%s3728_s3 + $0x110] sm:$0xff]   ;;  %vm717_vm3 = vcmask 130048   ;;  %vm782_vm4 = vcmask 1041408   ;;  %vm783_vm5 = vcmask 1042432  }
   0xe   : > { %v437_v0 = vld [vmem:[%s3247_s30] sm:$0x1f]  ;;  %2818 = vmatprep.subr.bf16.mxu0 %v3157_v8  ;;  %2830 = vmatprep.subr.bf16.mxu1 %v3157_v8  ;;  %v3054_v28 = vld [vmem:[%s3728_s3 + $0x108] sm:$0xff]   ;;  %v3056_v44 = vld [vmem:[%s3728_s3 + $0x38] sm:$0xff]   ;;  %v3159_v48 = vmov 65535   ;;  %vm764_vm6 = vcmask 36864  }
   0xf   : > { %v441_v1 = vsel %vm440_vm0, %v437_v0, 0.0  ;;  %v3051_v15 = vld [vmem:[%s3728_s3 + $0x80] sm:$0xff]   ;;  %2824 = vmatprep.mubr.msk.bf16.mxu0 %vm3158_vm1, %v3157_v8  ;;  %2836 = vmatprep.mubr.msk.bf16.mxu1 %vm3158_vm1, %v3157_v8  ;;  %v2516_v46 = vld [vmem:[%s3729_s4 + $0x8] ss:$0 sm:$0xff]  ;;  %v3057_v47 = vld [vmem:[%s3728_s3 + $0x30] sm:$0xff]   ;;  %v784_v49 = vsel %vm782_vm4, 4294967295, %v3159_v48 }
  0x10   : > { %442 = vadd.xlane.f32.xlu0 %v441_v1  ;;  %v2484_v20 = vld [vmem:[%s3726_s1] ss:$0 sm:$0xff]  ;;  %v2501_v30 = vld [vmem:[%s3729_s4 + $0x4] ss:$0 sm:$0xff]  ;;  %v3347_v52 = vsel %vm783_vm5, %v784_v49, 0  ;;  %v3058_v54 = vld [vmem:[%s3728_s3 + $0x28] sm:$0xff]  }
  0x11   : > { %2819 = vmatpush3.bf16.msra.mxu0 %v3046_v10  ;;  %2831 = vmatpush3.bf16.msra.mxu1 %v3047_v11  ;;  %v2485_v22 = vld [vmem:[%s3727_s2] ss:$0 sm:$0xff]  ;;  %v3060_v60 = vld [vmem:[%s3728_s3 + $0x138] sm:$0xff]   ;;  %v3061_v61 = vld [vmem:[%s3728_s3 + $0x130] sm:$0xff]   ;;  %vm778_vm7 = vcmask 39936  }
  0x12   : > { %2820 = vmatprep.subr.bf16.mxu0 %v3157_v8  ;;  %2832 = vmatprep.subr.bf16.mxu1 %v3157_v8  ;;  %v3055_v29 = vld [vmem:[%s3728_s3 + $0x100] sm:$0xff]   ;;  %v3062_v62 = vld [vmem:[%s3728_s3 + $0x128] sm:$0xff]  }
  0x13   : > { %v2486_v37 = vld [vmem:[%s3729_s4] ss:$0 sm:$0xff] }
  0x14   : > { %v3059_v59 = vld [vmem:[%s3728_s3 + $0x20] sm:$0xff]  }
  0x15   : > { %2821 = vmatpush3.bf16.msra.mxu0 %v3048_v12  ;;  %2833 = vmatpush3.bf16.msra.mxu1 %v3049_v13  ;;  %v3063_v63 = vld [vmem:[%s3728_s3 + $0x120] sm:$0xff]  }
  0x16   : > { %2822 = vmatprep.subr.bf16.mxu0 %v3157_v8  ;;  %2834 = vmatprep.subr.bf16.mxu1 %v3157_v8 }
  0x19   : > { %2823 = vmatpush3.bf16.msra.mxu0 %v3050_v14  ;;  %2835 = vmatpush3.bf16.msra.mxu1 %v3051_v15 }
  0x1a   : > { %2840 = vmatprep.subr.bf16.mxu0 %v3157_v8  ;;  %2858 = vmatprep.subr.bf16.mxu1 %v3157_v8 }
  0x99   : > { %v443_v2 = vpop.xlane.xlu0 %442 }
  0x9a   : > { %v445_v3 = vmul.f32 0.015625, %v443_v2 }
  0x9c   : > { %v446_v4 = vsub.f32 %v437_v0, %v445_v3 }
  0x9e   : > { %v447_v5 = vmul.f32 %v446_v4, %v446_v4 }
  0xa0   : > { %v448_v6 = vsel %vm440_vm0, %v447_v5, 0.0 }
  0xa1   : > { %449 = vadd.xlane.f32.xlu0 %v448_v6 }
 0x12a   : > { %v450_v16 = vpop.xlane.xlu0 %449 }
 0x12b   : > { %v451_v17 = vmul.f32 0.015625, %v450_v16 }
 0x12d   : > { %v452_v18 = vadd.f32 1e-06, %v451_v17 }
 0x12f   : > { %3124 = vrsqrt.f32 %v452_v18 }
 0x13c   : > { %v3125_v19 = vpop.eup %3124 }
 0x13d   : > { %v454_v21 = vmul.f32 %v3125_v19, %v446_v4 }
 0x13f   : > { %v461_v23 = vmul.f32 %v2484_v20, %v454_v21 }
 0x141   : > { %v468_v24 = vadd.f32 %v2485_v22, %v461_v23  ;;  %v3064_v22 = vld [vmem:[%s3728_s3 + $0xb8] sm:$0xff]  }
 0x143   : > { %v3299_v26 = vpack.c.bf16 %v468_v24, %v468_v24  ;;  %v3065_v24 = vld [vmem:[%s3728_s3 + $0xb0] sm:$0xff]  }
 0x145   : > { %2825 = vmatmul.mubr.msk.bf16.vlgmr.msra.gmra.mxu0 %vm509_vm2, %v3299_v26  ;;  %2837 = vmatmul.mubr.msk.bf16.vlgmr.msra.gmra.mxu1 %vm509_vm2, %v3299_v26 }
 0x146   : > { %2841 = vmatpush3.bf16.msra.mxu0 %v3052_v25  ;;  %2848 = vmatprep.mubr.msk.bf16.mxu0 %vm3158_vm1, %v3157_v8  ;;  %v3066_v25 = vld [vmem:[%s3728_s3 + $0xa8] sm:$0xff]  }
 0x147   : > { %2842 = vmatprep.subr.bf16.mxu0 %v3157_v8  ;;  %2860 = vmatprep.mubr.msk.bf16.mxu1 %vm3158_vm1, %v3157_v8 }
 0x14a   : > { %2843 = vmatpush3.bf16.msra.mxu0 %v3053_v27  ;;  %v3067_v27 = vld [vmem:[%s3728_s3 + $0xa0] sm:$0xff]  }
 0x14b   : > { %2844 = vmatprep.subr.bf16.mxu0 %v3157_v8 }
 0x14e   : > { %2845 = vmatpush3.bf16.msra.mxu0 %v3054_v28 }
 0x14f   : > { %2846 = vmatprep.subr.bf16.mxu0 %v3157_v8 }
 0x152   : > { %2847 = vmatpush3.bf16.msra.mxu0 %v3055_v29 }
 0x153   : > { %2852 = vmatprep.subr.bf16.mxu0 %v3157_v8 }
 0x155   : > { %2849 = vmatmul.mubr.msk.bf16.vlgmr.msra.gmra.mxu0 %vm509_vm2, %v3299_v26 }
 0x156   : > { %2854 = vmatprep.mubr.msk.bf16.mxu0 %vm3158_vm1, %v3157_v8 }
 0x205   : > { %v547_v31 = vpop.f32.mrf.mxu0  ;;  %v628_v32 = vpop.f32.mrf.mxu1 }
 0x206   : > { %v629_v33 = vadd.f32 %v2501_v30, %v628_v32  ;;  %v548_v43 = vadd.f32 %v2486_v37, %v547_v31  ;;  %v2548_v32 = vld [vmem:[%s3729_s4 + $0x5] ss:$0 sm:$0xff] }
 0x207   : > { %v2826_v34 = vpop.f32.mrf.mxu0  ;;  %v2838_v35 = vpop.f32.mrf.mxu1 }
 0x208   : > { %v716_v36 = vpack.c.bf16 %v629_v33, %v629_v33  ;;  %v715_v45 = vpack.c.bf16 %v548_v43, %v548_v43  ;;  %v2563_v34 = vld [vmem:[%s3729_s4 + $0x9] ss:$0 sm:$0xff] }
 0x209   : > { %v550_v38 = vpop.f32.mrf.mxu0  ;;  %v631_v39 = vpop.f32.mrf.mxu1 }
 0x20a   : > { %v722_v40 = vsel %vm717_vm3, %v716_v36, 0  ;;  %v2533_v38 = vld [vmem:[%s3729_s4 + $0x1] ss:$0 sm:$0xff] }
 0x20b   : > { %v2827_v41 = vpop.f32.mrf.mxu0  ;;  %v2839_v42 = vpop.f32.mrf.mxu1  ;;  %2853 = vmatpush3.bf16.xpose.msra.mxu0 %v722_v40 }
 0x20c   : > { %2864 = vmatprep.subr.bf16.mxu0 %v3157_v8 }
 0x212   : > { %2855 = vmatmul.mubr.msk.bf16.vlgmr.msra.gmra.mxu0 %vm717_vm3, %v715_v45 }
 0x213   : > { %2865 = vmatpush3.bf16.msra.mxu0 %v3056_v44  ;;  %2872 = vmatprep.mubr.msk.bf16.mxu0 %vm3158_vm1, %v3157_v8 }
 0x214   : > { %2866 = vmatprep.subr.bf16.mxu0 %v3157_v8 }
 0x215   : > { %v709_v50 = vpop.f32.mrf.mxu0 }
 0x216   : > { %v710_v51 = vadd.f32 %v2516_v46, %v709_v50 }
 0x217   : > { %v2850_v53 = vpop.f32.mrf.mxu0  ;;  %2867 = vmatpush3.bf16.msra.mxu0 %v3057_v47 }
 0x218   : > { %v777_v55 = vpack.c.bf16 %v710_v51, %v710_v51  ;;  %2868 = vmatprep.subr.bf16.mxu0 %v3157_v8 }
 0x219   : > { %v712_v56 = vpop.f32.mrf.mxu0 }
 0x21a   : > { %v787_v57 = vand.u32 %v3347_v52, %v777_v55 }
 0x21b   : > { %v2851_v58 = vpop.f32.mrf.mxu0  ;;  %2869 = vmatpush3.bf16.msra.mxu0 %v3058_v54 }
 0x21c   : > { %2859 = vmatpush3.bf16.msra.mxu1 %v787_v57  ;;  %2870 = vmatprep.subr.bf16.mxu0 %v3157_v8  ;;  %v3073_v58 = vld [vmem:[%s3730_s5 + $0x8] sm:$0xff]  }
 0x21d   : > { %2876 = vmatprep.subr.bf16.mxu1 %v3157_v8 }
 0x21f   : > { %2871 = vmatpush3.bf16.msra.mxu0 %v3059_v59 }
 0x220   : > { %2888 = vmatprep.subr.bf16.mxu0 %v3157_v8 }
 0x222   : > { %2873 = vmatmul.mubr.msk.bf16.vlgmr.msra.gmra.mxu0 %vm509_vm2, %v3299_v26 }
 0x223   : > { %2889 = vmatpush3.bf16.msra.mxu0 %v3060_v60  ;;  %2896 = vmatprep.mubr.msk.bf16.mxu0 %vm3158_vm1, %v3157_v8 }
 0x224   : > { %2890 = vmatprep.subr.bf16.mxu0 %v3157_v8 }
 0x227   : > { %2891 = vmatpush3.bf16.msra.mxu0 %v3061_v61 }
 0x228   : > { %2892 = vmatprep.subr.bf16.mxu0 %v3157_v8 }
 0x22b   : > { %2893 = vmatpush3.bf16.msra.mxu0 %v3062_v62  ;;  %v3068_v62 = vld [vmem:[%s3730_s5] sm:$0xff]  }
 0x22c   : > { %2894 = vmatprep.subr.bf16.mxu0 %v3157_v8 }
 0x22f   : > { %2895 = vmatpush3.bf16.msra.mxu0 %v3063_v63 }
 0x230   : > { %2912 = vmatprep.subr.bf16.mxu0 %v3157_v8 }
 0x232   : > { %2897 = vmatmul.mubr.msk.bf16.vlgmr.msra.gmra.mxu0 %vm509_vm2, %v3299_v26 }
 0x233   : > { %2914 = vmatprep.mubr.msk.bf16.mxu0 %vm3158_vm1, %v3157_v8  ;;  %2913 = vmatpush3.bf16.msra.mxu0 %v3073_v58 }
 0x234   : > { %2924 = vmatprep.subr.bf16.mxu0 %v3157_v8 }
 0x2d2   : > { %v758_v0 = vpop.f32.mrf.mxu0 }
 0x2d3   : > { %v765_v1 = vsel %vm764_vm6, %v758_v0, -inf }
 0x2d4   : > { %766 = vmax.xlane.f32.xlu1 %v765_v1  ;;  %v2856_v2 = vpop.f32.mrf.mxu0 }
 0x2d5   : > { %v3070_v2 = vld [vmem:[%s3728_s3 + $0xd0] sm:$0xff]  }
 0x2d6   : > { %v761_v3 = vpop.f32.mrf.mxu0 }
 0x2d7   : > { %v3071_v3 = vld [vmem:[%s3728_s3 + $0xc8] sm:$0xff]  }
 0x2d8   : > { %v2857_v4 = vpop.f32.mrf.mxu0 }
 0x2d9   : > { %v3072_v4 = vld [vmem:[%s3728_s3 + $0xc0] sm:$0xff]  }
 0x2e2   : > { %v907_v5 = vpop.f32.mrf.mxu0 }
 0x2e3   : > { %v908_v43 = vadd.f32 %v2533_v38, %v907_v5 }
 0x2e4   : > { %v2874_v6 = vpop.f32.mrf.mxu0 }
 0x2e5   : > { %v1075_v45 = vpack.c.bf16 %v908_v43, %v908_v43  ;;  %v3074_v6 = vld [vmem:[%s3728_s3 + $0x58] sm:$0xff]   ;;  %v2616_v43 = vld [vmem:[%s3729_s4 + $0xa] ss:$0 sm:$0xff] }
 0x2e6   : > { %v910_v7 = vpop.f32.mrf.mxu0 }
 0x2e8   : > { %v2875_v9 = vpop.f32.mrf.mxu0 }
 0x2f2   : > { %v1069_v10 = vpop.f32.mrf.mxu0 }
 0x2f3   : > { %v1070_v39 = vadd.f32 %v2563_v34, %v1069_v10 }
 0x2f4   : > { %v2898_v11 = vpop.f32.mrf.mxu0 }
 0x2f5   : > { %v1135_v44 = vpack.c.bf16 %v1070_v39, %v1070_v39  ;;  %v3075_v11 = vld [vmem:[%s3728_s3 + $0x50] sm:$0xff]  }
 0x2f6   : > { %v1072_v12 = vpop.f32.mrf.mxu0 }
 0x2f7   : > { %v1140_v46 = vand.u32 %v1135_v44, %v3347_v52 }
 0x2f8   : > { %v2899_v13 = vpop.f32.mrf.mxu0 }
 0x35d   : > { %v767_v14 = vpop.xlane.xlu1 %766 }
 0x35e   : > { %v768_v15 = vsub.f32 %v758_v0, %v767_v14  ;;  %v3069_v0 = vld [vmem:[%s3728_s3 + $0xd8] sm:$0xff]   ;;  %v3076_v14 = vld [vmem:[%s3728_s3 + $0x48] sm:$0xff]  }
 0x360   : > { %v769_v16 = vmul.f32 1.442695, %v768_v15 }
 0x362   : > { %3126 = vpow2.f32 %v769_v16 }
 0x36f   : > { %v3127_v17 = vpop.eup %3126 }
 0x370   : > { %v771_v18 = vsel %vm764_vm6, %v3127_v17, 0.0 }
 0x371   : > { %772 = vadd.xlane.f32.xlu1 %v771_v18 }
 0x3fa   : > { %v773_v19 = vpop.xlane.xlu1 %772 }
 0x3fb   : > { %3128 = vrcp.f32 %v773_v19  ;;  %v3078_v19 = vld [vmem:[%s3728_s3 + $0x158] sm:$0xff]  }
 0x408   : > { %v3129_v20 = vpop.eup %3128 }
 0x409   : > { %v775_v21 = vmul.f32 %v3129_v20, %v3127_v17  ;;  %v3077_v17 = vld [vmem:[%s3728_s3 + $0x40] sm:$0xff]   ;;  %v3079_v20 = vld [vmem:[%s3728_s3 + $0x150] sm:$0xff]  }
 0x40b   : > { %v776_v23 = vpack.c.bf16 %v775_v21, %v775_v21  ;;  %v2601_v21 = vld [vmem:[%s3729_s4 + $0x6] ss:$0 sm:$0xff] }
 0x40d   : > { %2861 = vmatmul.mubr.msk.bf16.vlgmr.msra.gmra.mxu1 %vm778_vm7, %v776_v23  ;;  %v3080_v23 = vld [vmem:[%s3728_s3 + $0x148] sm:$0xff]  }
 0x40e   : > { %2877 = vmatpush3.bf16.msra.mxu1 %v3064_v22  ;;  %2884 = vmatprep.mubr.msk.bf16.mxu1 %vm3158_vm1, %v3157_v8 }
 0x40f   : > { %2878 = vmatprep.subr.bf16.mxu1 %v3157_v8 }
 0x412   : > { %2879 = vmatpush3.bf16.msra.mxu1 %v3065_v24 }
 0x413   : > { %2880 = vmatprep.subr.bf16.mxu1 %v3157_v8 }
 0x416   : > { %2881 = vmatpush3.bf16.msra.mxu1 %v3066_v25 }
 0x417   : > { %2882 = vmatprep.subr.bf16.mxu1 %v3157_v8 }
 0x41a   : > { %2883 = vmatpush3.bf16.msra.mxu1 %v3067_v27 }
 0x41b   : > { %2900 = vmatprep.subr.bf16.mxu1 %v3157_v8 }
 0x41d   : > { %2885 = vmatmul.mubr.msk.bf16.vlgmr.msra.gmra.mxu1 %vm509_vm2, %v3299_v26 }
 0x41e   : > { %2902 = vmatprep.mubr.msk.bf16.mxu1 %vm3158_vm1, %v3157_v8 }
 0x4cd   : > { %v823_v28 = vpop.f32.mrf.mxu1 }
 0x4ce   : > { %v829_v1 = vpack.c.bf16 %v823_v28, %v823_v28 }
 0x4cf   : > { %v2862_v29 = vpop.f32.mrf.mxu1 }
 0x4d0   : > { %v3081_v29 = vld [vmem:[%s3728_s3 + $0x140] sm:$0xff]  }
 0x4d1   : > { %v826_v30 = vpop.f32.mrf.mxu1 }
 0x4d3   : > { %v2863_v31 = vpop.f32.mrf.mxu1 }
 0x4dd   : > { %v988_v33 = vpop.f32.mrf.mxu1 }
 0x4de   : > { %v989_v35 = vadd.f32 %v2548_v32, %v988_v33 }
 0x4df   : > { %v2886_v36 = vpop.f32.mrf.mxu1 }
 0x4e0   : > { %v1076_v37 = vpack.c.bf16 %v989_v35, %v989_v35  ;;  %v2586_v36 = vld [vmem:[%s3729_s4 + $0x2] ss:$0 sm:$0xff] }
 0x4e1   : > { %v991_v40 = vpop.f32.mrf.mxu1 }
 0x4e2   : > { %v1081_v41 = vsel %vm717_vm3, %v1076_v37, 0 }
 0x4e3   : > { %v2887_v42 = vpop.f32.mrf.mxu1  ;;  %2901 = vmatpush3.bf16.xpose.msra.mxu1 %v1081_v41 }
 0x4e4   : > { %2906 = vmatprep.subr.bf16.mxu1 %v3157_v8 }
 0x4ea   : > { %2903 = vmatmul.mubr.msk.bf16.vlgmr.msra.gmra.mxu1 %vm717_vm3, %v1075_v45 }
 0x4eb   : > { %2907 = vmatpush3.bf16.msra.mxu1 %v1140_v46  ;;  %2908 = vmatprep.mubr.msk.bf16.mxu1 %vm3158_vm1, %v3157_v8 }
 0x4ec   : > { %2918 = vmatprep.subr.bf16.mxu1 %v3157_v8 }
 0x5aa   : > { %v1117_v47 = vpop.f32.mrf.mxu1 }
 0x5ab   : > { %v1123_v48 = vsel %vm764_vm6, %v1117_v47, -inf }
 0x5ac   : > { %1124 = vmax.xlane.f32.xlu0 %v1123_v48  ;;  %v2904_v49 = vpop.f32.mrf.mxu1 }
 0x5ae   : > { %v1120_v50 = vpop.f32.mrf.mxu1 }
 0x5b0   : > { %v2905_v51 = vpop.f32.mrf.mxu1 }
 0x635   : > { %v1125_v53 = vpop.xlane.xlu0 %1124 }
 0x636   : > { %v1126_v54 = vsub.f32 %v1117_v47, %v1125_v53 }
 0x638   : > { %v1127_v55 = vmul.f32 1.442695, %v1126_v54 }
 0x63a   : > { %3130 = vpow2.f32 %v1127_v55 }
 0x647   : > { %v3131_v56 = vpop.eup %3130 }
 0x648   : > { %v1129_v57 = vsel %vm764_vm6, %v3131_v56, 0.0 }
 0x649   : > { %1130 = vadd.xlane.f32.xlu1 %v1129_v57 }
 0x6d2   : > { %v1131_v59 = vpop.xlane.xlu1 %1130 }
 0x6d3   : > { %3132 = vrcp.f32 %v1131_v59 }
 0x6e0   : > { %v3133_v60 = vpop.eup %3132 }
 0x6e1   : > { %v1133_v61 = vmul.f32 %v3133_v60, %v3131_v56 }
 0x6e3   : > { %v1134_v63 = vpack.c.bf16 %v1133_v61, %v1133_v61 }
 0x6e5   : > { %2909 = vmatmul.mubr.msk.bf16.vlgmr.msra.gmra.mxu1 %vm778_vm7, %v1134_v63 }
 0x6e6   : > { %2919 = vmatpush3.bf16.msra.mxu1 %v3068_v62  ;;  %2920 = vmatprep.mubr.msk.bf16.mxu1 %vm3158_vm1, %v3157_v8  ;;  %v3090_v62 = vld [vmem:[%s3730_s5 + $0x10] sm:$0xff]  }
 0x6e7   : > { %2936 = vmatprep.subr.bf16.mxu1 %v3157_v8 }
 0x6ed   : > { %2921 = vmatmul.mubr.msk.bf16.vlgmr.msra.gmra.mxu1 %vm717_vm3, %v829_v1 }
 0x6ee   : > { %2937 = vmatpush3.bf16.msra.mxu1 %v3069_v0  ;;  %2944 = vmatprep.mubr.msk.bf16.mxu1 %vm3158_vm1, %v3157_v8 }
 0x6ef   : > { %2938 = vmatprep.subr.bf16.mxu1 %v3157_v8 }
 0x6f2   : > { %2939 = vmatpush3.bf16.msra.mxu1 %v3070_v2  ;;  %v3082_v2 = vld [vmem:[%s3728_s3 + $0x78] sm:$0xff]  }
 0x6f3   : > { %2940 = vmatprep.subr.bf16.mxu1 %v3157_v8 }
 0x6f6   : > { %2941 = vmatpush3.bf16.msra.mxu1 %v3071_v3 }
 0x6f7   : > { %2942 = vmatprep.subr.bf16.mxu1 %v3157_v8 }
 0x6fa   : > { %2943 = vmatpush3.bf16.msra.mxu1 %v3072_v4  ;;  %v3083_v4 = vld [vmem:[%s3728_s3 + $0x70] sm:$0xff]  }
 0x6fb   : > { %2960 = vmatprep.subr.bf16.mxu1 %v3157_v8 }
 0x6fd   : > { %2945 = vmatmul.mubr.msk.bf16.vlgmr.msra.gmra.mxu1 %vm509_vm2, %v3299_v26 }
 0x6fe   : > { %2962 = vmatprep.mubr.msk.bf16.mxu1 %vm3158_vm1, %v3157_v8 }
 0x7a5   : > { %v1176_v5 = vpop.f32.mrf.mxu1 }
 0x7a6   : > { %v1182_v7 = vpack.c.bf16 %v1176_v5, %v1176_v5  ;;  %v3084_v5 = vld [vmem:[%s3728_s3 + $0x68] sm:$0xff]  }
 0x7a7   : > { %v2910_v9 = vpop.f32.mrf.mxu1 }
 0x7a8   : > { %2915 = vmatmul.mubr.msk.bf16.vlgmr.msra.gmra.mxu0 %vm717_vm3, %v1182_v7  ;;  %v3086_v7 = vld [vmem:[%s3728_s3 + $0x178] sm:$0xff]   ;;  %v3087_v9 = vld [vmem:[%s3728_s3 + $0x170] sm:$0xff]  }
 0x7a9   : > { %2925 = vmatpush3.bf16.msra.mxu0 %v3074_v6  ;;  %v1179_v10 = vpop.f32.mrf.mxu1  ;;  %2932 = vmatprep.mubr.msk.bf16.mxu0 %vm3158_vm1, %v3157_v8  ;;  %v3085_v6 = vld [vmem:[%s3728_s3 + $0x60] sm:$0xff]  }
 0x7aa   : > { %2926 = vmatprep.subr.bf16.mxu0 %v3157_v8  ;;  %v3088_v10 = vld [vmem:[%s3728_s3 + $0x168] sm:$0xff]  }
 0x7ab   : > { %v2911_v12 = vpop.f32.mrf.mxu1 }
 0x7ad   : > { %2927 = vmatpush3.bf16.msra.mxu0 %v3075_v11  ;;  %v3471_v13 = vpop.f32.mrf.mxu1  ;;  %v3089_v11 = vld [vmem:[%s3728_s3 + $0x160] sm:$0xff]  }
 0x7ae   : > { %2928 = vmatprep.subr.bf16.mxu0 %v3157_v8 }
 0x7af   : > { %v2922_v15 = vpop.f32.mrf.mxu1 }
 0x7b1   : > { %2929 = vmatpush3.bf16.msra.mxu0 %v3076_v14  ;;  %v1281_v16 = vpop.f32.mrf.mxu1  ;;  %v3091_v14 = vld [vmem:[%s3728_s3 + $0xf8] sm:$0xff]  }
 0x7b2   : > { %2930 = vmatprep.subr.bf16.mxu0 %v3157_v8 }
 0x7b3   : > { %v2923_v18 = vpop.f32.mrf.mxu1 }
 0x7b4   : > { %v3092_v18 = vld [vmem:[%s3728_s3 + $0xf0] sm:$0xff]  }
 0x7b5   : > { %2931 = vmatpush3.bf16.msra.mxu0 %v3077_v17 }
 0x7b6   : > { %2948 = vmatprep.subr.bf16.mxu0 %v3157_v8 }
 0x7b8   : > { %2933 = vmatmul.mubr.msk.bf16.vlgmr.msra.gmra.mxu0 %vm509_vm2, %v3299_v26 }
 0x7b9   : > { %2949 = vmatpush3.bf16.msra.mxu0 %v3078_v19  ;;  %2956 = vmatprep.mubr.msk.bf16.mxu0 %vm3158_vm1, %v3157_v8 }
 0x7ba   : > { %2950 = vmatprep.subr.bf16.mxu0 %v3157_v8 }
 0x7bd   : > { %v1440_v22 = vpop.f32.mrf.mxu1  ;;  %2951 = vmatpush3.bf16.msra.mxu0 %v3079_v20  ;;  %v3093_v20 = vld [vmem:[%s3728_s3 + $0xe8] sm:$0xff]  }
 0x7be   : > { %v1441_v24 = vadd.f32 %v2601_v21, %v1440_v22  ;;  %2952 = vmatprep.subr.bf16.mxu0 %v3157_v8  ;;  %v3094_v21 = vld [vmem:[%s3728_s3 + $0xe0] sm:$0xff]  }
 0x7bf   : > { %v2946_v25 = vpop.f32.mrf.mxu1 }
 0x7c0   : > { %v1528_v27 = vpack.c.bf16 %v1441_v24, %v1441_v24 }
 0x7c1   : > { %v1443_v28 = vpop.f32.mrf.mxu1  ;;  %2953 = vmatpush3.bf16.msra.mxu0 %v3080_v23 }
 0x7c2   : > { %v1533_v30 = vsel %vm717_vm3, %v1528_v27, 0  ;;  %2954 = vmatprep.subr.bf16.mxu0 %v3157_v8 }
 0x7c3   : > { %v2947_v31 = vpop.f32.mrf.mxu1  ;;  %2961 = vmatpush3.bf16.xpose.msra.mxu1 %v1533_v30 }
 0x7c4   : > { %2966 = vmatprep.subr.bf16.mxu1 %v3157_v8 }
 0x7c5   : > { %2955 = vmatpush3.bf16.msra.mxu0 %v3081_v29 }
 0x7c6   : > { %2972 = vmatprep.subr.bf16.mxu0 %v3157_v8 }
 0x7c8   : > { %2957 = vmatmul.mubr.msk.bf16.vlgmr.msra.gmra.mxu0 %vm509_vm2, %v3299_v26 }
 0x7c9   : > { %2974 = vmatprep.mubr.msk.bf16.mxu0 %vm3158_vm1, %v3157_v8  ;;  %2973 = vmatpush3.bf16.msra.mxu0 %v3090_v62 }
 0x7ca   : > { %2990 = vmatprep.subr.bf16.mxu0 %v3157_v8 }
 0x868   : > { %v3511_v32 = vpop.f32.mrf.mxu0 }
 0x869   : > { %v1279_v31 = vadd.f32 %v3471_v13, %v3511_v32  ;;  %v2637_v13 = vld [vmem:[%s3729_s4 + $0x3] ss:$0 sm:$0xff] }
 0x86a   : > { %v2916_v33 = vpop.f32.mrf.mxu0 }
 0x86c   : > { %v1232_v34 = vpop.f32.mrf.mxu0 }
 0x86e   : > { %v2917_v35 = vpop.f32.mrf.mxu0 }
 0x878   : > { %v1359_v37 = vpop.f32.mrf.mxu0 }
 0x879   : > { %v1360_v38 = vadd.f32 %v2586_v36, %v1359_v37 }
 0x87a   : > { %v2934_v39 = vpop.f32.mrf.mxu0 }
 0x87b   : > { %v1527_v40 = vpack.c.bf16 %v1360_v38, %v1360_v38  ;;  %v2667_v39 = vld [vmem:[%s3729_s4 + $0xb] ss:$0 sm:$0xff] }
 0x87c   : > { %v1362_v41 = vpop.f32.mrf.mxu0 }
 0x87d   : > { %2963 = vmatmul.mubr.msk.bf16.vlgmr.msra.gmra.mxu1 %vm717_vm3, %v1527_v40 }
 0x87e   : > { %v2935_v42 = vpop.f32.mrf.mxu0  ;;  %2968 = vmatprep.mubr.msk.bf16.mxu1 %vm3158_vm1, %v3157_v8 }
 0x888   : > { %v1521_v44 = vpop.f32.mrf.mxu0 }
 0x889   : > { %v1522_v45 = vadd.f32 %v2616_v43, %v1521_v44 }
 0x88a   : > { %v2958_v46 = vpop.f32.mrf.mxu0 }
 0x88b   : > { %v1587_v47 = vpack.c.bf16 %v1522_v45, %v1522_v45 }
 0x88c   : > { %v1524_v48 = vpop.f32.mrf.mxu0 }
 0x88d   : > { %v1592_v49 = vand.u32 %v1587_v47, %v3347_v52 }
 0x88e   : > { %v2959_v50 = vpop.f32.mrf.mxu0 }
 0x88f   : > { %2967 = vmatpush3.bf16.msra.mxu1 %v1592_v49 }
 0x890   : > { %2978 = vmatprep.subr.bf16.mxu1 %v3157_v8 }
 0x93d   : > { %v1569_v51 = vpop.f32.mrf.mxu1 }
 0x93e   : > { %v1575_v53 = vsel %vm764_vm6, %v1569_v51, -inf }
 0x93f   : > { %1576 = vmax.xlane.f32.xlu0 %v1575_v53  ;;  %v2964_v54 = vpop.f32.mrf.mxu1 }
 0x941   : > { %v1572_v55 = vpop.f32.mrf.mxu1 }
 0x943   : > { %v2965_v56 = vpop.f32.mrf.mxu1 }
 0x9c8   : > { %v1577_v57 = vpop.xlane.xlu0 %1576 }
 0x9c9   : > { %v1578_v58 = vsub.f32 %v1569_v51, %v1577_v57 }
 0x9cb   : > { %v1579_v59 = vmul.f32 1.442695, %v1578_v58 }
 0x9cd   : > { %3134 = vpow2.f32 %v1579_v59 }
 0x9da   : > { %v3135_v60 = vpop.eup %3134 }
 0x9db   : > { %v1581_v61 = vsel %vm764_vm6, %v3135_v60, 0.0 }
 0x9dc   : > { %1582 = vadd.xlane.f32.xlu1 %v1581_v61 }
 0xa65   : > { %v1583_v63 = vpop.xlane.xlu1 %1582 }
 0xa66   : > { %3136 = vrcp.f32 %v1583_v63 }
 0xa73   : > { %v3137_v0 = vpop.eup %3136 }
 0xa74   : > { %v1585_v1 = vmul.f32 %v3137_v0, %v3135_v60  ;;  %v3095_v60 = vld [vmem:[%s3730_s5 + $0x18] sm:$0xff]  }
 0xa76   : > { %v1586_v3 = vpack.c.bf16 %v1585_v1, %v1585_v1 }
 0xa78   : > { %2969 = vmatmul.mubr.msk.bf16.vlgmr.msra.gmra.mxu1 %vm778_vm7, %v1586_v3 }
 0xa79   : > { %2979 = vmatpush3.bf16.msra.mxu1 %v3082_v2  ;;  %2986 = vmatprep.mubr.msk.bf16.mxu1 %vm3158_vm1, %v3157_v8 }
 0xa7a   : > { %2980 = vmatprep.subr.bf16.mxu1 %v3157_v8 }
 0xa7d   : > { %2981 = vmatpush3.bf16.msra.mxu1 %v3083_v4 }
 0xa7e   : > { %2982 = vmatprep.subr.bf16.mxu1 %v3157_v8 }
 0xa81   : > { %2983 = vmatpush3.bf16.msra.mxu1 %v3084_v5 }
 0xa82   : > { %2984 = vmatprep.subr.bf16.mxu1 %v3157_v8 }
 0xa85   : > { %2985 = vmatpush3.bf16.msra.mxu1 %v3085_v6 }
 0xa86   : > { %3002 = vmatprep.subr.bf16.mxu1 %v3157_v8 }
 0xa88   : > { %2987 = vmatmul.mubr.msk.bf16.vlgmr.msra.gmra.mxu1 %vm509_vm2, %v3299_v26 }
 0xa89   : > { %3003 = vmatpush3.bf16.msra.mxu1 %v3086_v7  ;;  %3010 = vmatprep.mubr.msk.bf16.mxu1 %vm3158_vm1, %v3157_v8  ;;  %v2679_v7 = vld [vmem:[%s3731_s6] ss:$0 sm:$0xff] }
 0xa8a   : > { %3004 = vmatprep.subr.bf16.mxu1 %v3157_v8 }
 0xa8d   : > { %3005 = vmatpush3.bf16.msra.mxu1 %v3087_v9 }
 0xa8e   : > { %3006 = vmatprep.subr.bf16.mxu1 %v3157_v8 }
 0xa91   : > { %3007 = vmatpush3.bf16.msra.mxu1 %v3088_v10  ;;  %v3148_v10 = vld [vmem:[%s3247_s30] sm:$0x1f]  ;;  %s435_s30 = scalar_lea.vmem %s3738_s13, %s2482_s27 }
 0xa92   : > { %3008 = vmatprep.subr.bf16.mxu1 %v3157_v8 }
 0xa95   : > { %3009 = vmatpush3.bf16.msra.mxu1 %v3089_v11 }
 0xa96   : > { %3026 = vmatprep.subr.bf16.mxu1 %v3157_v8 }
 0xa98   : > { %3011 = vmatmul.mubr.msk.bf16.vlgmr.msra.gmra.mxu1 %vm509_vm2, %v3299_v26 }
 0xa99   : > { %3028 = vmatprep.mubr.msk.bf16.mxu1 %vm3158_vm1, %v3157_v8  ;;  %3027 = vmatpush3.bf16.msra.mxu1 %v3095_v60 }
 0xb38   : > { %v1628_v12 = vpop.f32.mrf.mxu1 }
 0xb39   : > { %v1634_v15 = vpack.c.bf16 %v1628_v12, %v1628_v12 }
 0xb3a   : > { %v2970_v16 = vpop.f32.mrf.mxu1 }
 0xb3b   : > { %2975 = vmatmul.mubr.msk.bf16.vlgmr.msra.gmra.mxu0 %vm717_vm3, %v1634_v15 }
 0xb3c   : > { %2991 = vmatpush3.bf16.msra.mxu0 %v3091_v14  ;;  %v1631_v17 = vpop.f32.mrf.mxu1  ;;  %2998 = vmatprep.mubr.msk.bf16.mxu0 %vm3158_vm1, %v3157_v8 }
 0xb3d   : > { %2992 = vmatprep.subr.bf16.mxu0 %v3157_v8 }
 0xb3e   : > { %v2971_v19 = vpop.f32.mrf.mxu1 }
 0xb40   : > { %2993 = vmatpush3.bf16.msra.mxu0 %v3092_v18 }
 0xb41   : > { %2994 = vmatprep.subr.bf16.mxu0 %v3157_v8 }
 0xb44   : > { %2995 = vmatpush3.bf16.msra.mxu0 %v3093_v20 }
 0xb45   : > { %2996 = vmatprep.subr.bf16.mxu0 %v3157_v8 }
 0xb48   : > { %v1763_v22 = vpop.f32.mrf.mxu1  ;;  %2997 = vmatpush3.bf16.msra.mxu0 %v3094_v21 }
 0xb49   : > { %3014 = vmatprep.subr.bf16.mxu0 %v3157_v8  ;;  %v1764_v46 = vadd.f32 %v2637_v13, %v1763_v22  ;;  %v3098_v22 = vld [vmem:[%s3734_s9 + $0x34] ss:$8 sps:$4 sm:$0xff]  }
 0xb4a   : > { %v2988_v23 = vpop.f32.mrf.mxu1 }
 0xb4b   : > { %2999 = vmatmul.mubr.msk.bf16.vlgmr.msra.gmra.mxu0 %vm509_vm2, %v3299_v26  ;;  %v2652_v26 = vld [vmem:[%s3729_s4 + $0x7] ss:$0 sm:$0xff]  ;;  %v1931_v48 = vpack.c.bf16 %v1764_v46, %v1764_v46  ;;  %v3096_v23 = vld [vmem:[%s3734_s9 + $0x30] ss:$8 sps:$4 sm:$0xff]  }
 0xb4c   : > { %v1766_v24 = vpop.f32.mrf.mxu1  ;;  %3016 = vmatprep.mubr.msk.bf16.mxu0 %vm3158_vm1, %v3157_v8  ;;  %v3114_v46 = vld [vmem:[%s3736_s11 + $0x60] sm:$0xff]  }
 0xb4d   : > { %v3101_v24 = vld [vmem:[%s3734_s9 + $0x24] ss:$8 sps:$4 sm:$0xff]  }
 0xb4e   : > { %v2989_v25 = vpop.f32.mrf.mxu1 }
 0xb4f   : > { %v3099_v25 = vld [vmem:[%s3734_s9 + $0x20] ss:$8 sps:$4 sm:$0xff]  }
 0xb58   : > { %v1925_v27 = vpop.f32.mrf.mxu1 }
 0xb59   : > { %v1926_v32 = vadd.f32 %v2667_v39, %v1925_v27  ;;  %v3104_v27 = vld [vmem:[%s3734_s9 + $0x14] ss:$8 sps:$4 sm:$0xff]  }
 0xb5a   : > { %v3012_v28 = vpop.f32.mrf.mxu1 }
 0xb5b   : > { %v1991_v47 = vpack.c.bf16 %v1926_v32, %v1926_v32  ;;  %v3102_v28 = vld [vmem:[%s3734_s9 + $0x10] ss:$8 sps:$4 sm:$0xff]  }
 0xb5c   : > { %v1928_v29 = vpop.f32.mrf.mxu1  ;;  %v3110_v32 = vld [vmem:[%s3736_s11 + $0x70] sm:$0xff]  }
 0xb5d   : > { %v1996_v49 = vand.u32 %v1991_v47, %v3347_v52  ;;  %v3107_v29 = vld [vmem:[%s3734_s9 + $0x4] ss:$8 sps:$4 sm:$0xff]  }
 0xb5e   : > { %v3013_v30 = vpop.f32.mrf.mxu1  ;;  %v3115_v47 = vld [vmem:[%s3736_s11 + $0x20] sm:$0xff]  }
 0xb5f   : > { %v3105_v30 = vld [vmem:[%s3734_s9] ss:$8 sps:$4 sm:$0xff]  }
 0xbfb   : > { %v1681_v33 = vpop.f32.mrf.mxu0 }
 0xbfc   : > { %v1687_v34 = vadd.f32 %v1681_v33, %v1279_v31  ;;  %v3160_v31 = vmov 0   ;;  %v3108_v33 = vld [vmem:[%s3736_s11 + $0x78] sm:$0xff]  }
 0xbfd   : > { %v2976_v35 = vpop.f32.mrf.mxu0  ;;  %2794 = vmatprep.subr.bf16.mxu1 %v3108_v33 }
 0xbff   : > { %v1684_v36 = vpop.f32.mrf.mxu0 }
 0xc01   : > { %v2977_v37 = vpop.f32.mrf.mxu0 }
 0xc0b   : > { %v1844_v38 = vpop.f32.mrf.mxu0 }
 0xc0c   : > { %v1845_v40 = vadd.f32 %v2652_v26, %v1844_v38  ;;  %v2680_v38 = vld [vmem:[%s3732_s7] ss:$0 sm:$0xff] }
 0xc0d   : > { %v3000_v41 = vpop.f32.mrf.mxu0 }
 0xc0e   : > { %v1932_v42 = vpack.c.bf16 %v1845_v40, %v1845_v40  ;;  %v2681_v40 = vld [vmem:[%s3733_s8] ss:$0 sm:$0xff] }
 0xc0f   : > { %v1847_v43 = vpop.f32.mrf.mxu0 }
 0xc10   : > { %v1937_v44 = vsel %vm717_vm3, %v1932_v42, 0  ;;  %v3111_v43 = vld [vmem:[%s3736_s11 + $0x30] sm:$0xff]  }
 0xc11   : > { %v3001_v45 = vpop.f32.mrf.mxu0  ;;  %3015 = vmatpush3.bf16.xpose.msra.mxu0 %v1937_v44  ;;  %v3112_v44 = vld [vmem:[%s3736_s11 + $0x68] sm:$0xff]  }
 0xc12   : > { %3020 = vmatprep.subr.bf16.mxu0 %v3157_v8  ;;  %v3113_v45 = vld [vmem:[%s3736_s11 + $0x28] sm:$0xff]  }
 0xc18   : > { %3017 = vmatmul.mubr.msk.bf16.vlgmr.msra.gmra.mxu0 %vm717_vm3, %v1931_v48  ;;  %v3116_v48 = vld [vmem:[%s3736_s11 + $0x58] sm:$0xff]  }
 0xc19   : > { %3021 = vmatpush3.bf16.msra.mxu0 %v1996_v49  ;;  %3022 = vmatprep.mubr.msk.bf16.mxu0 %vm3158_vm1, %v3157_v8  ;;  %v3117_v49 = vld [vmem:[%s3736_s11 + $0x18] sm:$0xff]  }
 0xc1a   : > { %2202 = vmatprep.subr.bf16.mxu0 %v3098_v22 }
 0xcd8   : > { %v1973_v50 = vpop.f32.mrf.mxu0 }
 0xcd9   : > { %v1979_v51 = vsel %vm764_vm6, %v1973_v50, -inf }
 0xcda   : > { %1980 = vmax.xlane.f32.xlu0 %v1979_v51  ;;  %v3018_v53 = vpop.f32.mrf.mxu0  ;;  %v3119_v51 = vld [vmem:[%s3736_s11 + $0x10] sm:$0xff]  }
 0xcdb   : > { %v3120_v53 = vld [vmem:[%s3736_s11 + $0x48] sm:$0xff]  }
 0xcdc   : > { %v1976_v54 = vpop.f32.mrf.mxu0 }
 0xcdd   : > { %v3121_v54 = vld [vmem:[%s3736_s11 + $0x8] sm:$0xff]  }
 0xcde   : > { %v3019_v55 = vpop.f32.mrf.mxu0 }
 0xcdf   : > { %v3122_v55 = vld [vmem:[%s3736_s11 + $0x40] sm:$0xff]  }
 0xd63   : > { %v1981_v56 = vpop.xlane.xlu0 %1980 }
 0xd64   : > { %v1982_v57 = vsub.f32 %v1973_v50, %v1981_v56  ;;  %v3118_v50 = vld [vmem:[%s3736_s11 + $0x50] sm:$0xff]   ;;  %v3123_v56 = vld [vmem:[%s3736_s11] sm:$0xff]  }
 0xd66   : > { %v1983_v58 = vmul.f32 1.442695, %v1982_v57  ;;  %v2141_v57 = vlaneseq }
 0xd68   : > { %3138 = vpow2.f32 %v1983_v58  ;;  %v2142_v58 = vshrl.u32 %v2141_v57, 7 }
 0xd6a   : > { %v2147_v60 = vsub.s32 1, %v2142_v58 }
 0xd75   : > { %v3139_v59 = vpop.eup %3138 }
 0xd76   : > { %v1985_v52 = vsel %vm764_vm6, %v3139_v59, 0.0 }
 0xd77   : > { %1986 = vadd.xlane.f32.xlu1 %v1985_v52  ;;  %v2139_v52 = vld [vmem:[%s3735_s10] sm:$0x3] }
 0xe00   : > { %v1987_v8 = vpop.xlane.xlu1 %1986 }
 0xe01   : > { %3140 = vrcp.f32 %v1987_v8 }
 0xe0e   : > { %v3141_v61 = vpop.eup %3140 }
 0xe0f   : > { %v1989_v62 = vmul.f32 %v3141_v61, %v3139_v59  ;;  %v2143_v59 = vsub.s32 0, %v2142_v58  ;;  %v2148_v61 = vrot.slane %v2139_v52, %v2147_v60 }
 0xe11   : > { %v1990_v63 = vpack.c.bf16 %v1989_v62, %v1989_v62  ;;  %v2144_v8 = vrot.slane %v2139_v52, %v2143_v59 }
 0xe13   : > { %3023 = vmatmul.mubr.msk.bf16.vlgmr.msra.gmra.mxu0 %vm778_vm7, %v1990_v63 }
 0xe14   : > { %2203 = vmatpush1.bf16.msra.mxu0 %v3096_v23  ;;  %2226 = vmatprep.mubr.bf16.mxu0 %v3160_v31 }
 0xe15   : > { %2204 = vmatprep.subr.bf16.mxu0 %v3101_v24 }
 0xe18   : > { %2205 = vmatpush1.bf16.msra.mxu0 %v3099_v25 }
 0xe19   : > { %2206 = vmatprep.subr.bf16.mxu0 %v3104_v27 }
 0xe1c   : > { %2207 = vmatpush1.bf16.msra.mxu0 %v3102_v28 }
 0xe1d   : > { %2208 = vmatprep.subr.bf16.mxu0 %v3107_v29 }
 0xe20   : > { %2209 = vmatpush1.bf16.msra.mxu0 %v3105_v30 }
 0xed3   : > { %v2032_v0 = vpop.f32.mrf.mxu0 }
 0xed4   : > { %v2038_v1 = vpack.c.bf16 %v2032_v0, %v2032_v0 }
 0xed5   : > { %v3024_v2 = vpop.f32.mrf.mxu0 }
 0xed6   : > { %3029 = vmatmul.mubr.msk.bf16.vlgmr.msra.gmra.mxu1 %vm717_vm3, %v2038_v1 }
 0xed7   : > { %v2035_v3 = vpop.f32.mrf.mxu0 }
 0xed9   : > { %v3025_v4 = vpop.f32.mrf.mxu0 }
 0xf96   : > { %v2085_v5 = vpop.f32.mrf.mxu1 }
 0xf97   : > { %v2091_v6 = vadd.f32 %v2085_v5, %v1687_v34  ;;  %v3109_v34 = vld [vmem:[%s3736_s11 + $0x38] sm:$0xff]  }
 0xf98   : > { %v3030_v9 = vpop.f32.mrf.mxu1  ;;  %2795 = vmatpush3.bf16.msra.mxu1 %v3109_v34 }
 0xf99   : > { %v2092_v11 = vadd.f32 %v3148_v10, %v2091_v6  ;;  %2796 = vmatprep.subr.bf16.mxu1 %v3110_v32 }
 0xf9a   : > { %v2088_v12 = vpop.f32.mrf.mxu1 }
 0xf9b   : > { %v3624_v14 = vadd.f32 %v2679_v7, %v2092_v11 }
 0xf9c   : > { %v3031_v15 = vpop.f32.mrf.mxu1  ;;  %2797 = vmatpush3.bf16.msra.mxu1 %v3111_v43 }
 0xf9d   : > { %v2103_v16 = vsel %vm440_vm0, %v3624_v14, 0.0  ;;  %2798 = vmatprep.subr.bf16.mxu1 %v3112_v44 }
 0xf9e   : > { %2104 = vadd.xlane.f32.xlu0 %v2103_v16 }
 0xfa0   : > { %2799 = vmatpush3.bf16.msra.mxu1 %v3113_v45 }
 0xfa1   : > { %2800 = vmatprep.subr.bf16.mxu1 %v3114_v46 }
 0xfa4   : > { %2801 = vmatpush3.bf16.msra.mxu1 %v3115_v47 }
 0xfa5   : > { %2802 = vmatprep.subr.bf16.mxu1 %v3116_v48 }
 0xfa8   : > { %2803 = vmatpush3.bf16.msra.mxu1 %v3117_v49 }
 0xfa9   : > { %2804 = vmatprep.subr.bf16.mxu1 %v3118_v50 }
 0xfac   : > { %2805 = vmatpush3.bf16.msra.mxu1 %v3119_v51 }
 0xfad   : > { %2806 = vmatprep.subr.bf16.mxu1 %v3120_v53 }
 0xfb0   : > { %2807 = vmatpush3.bf16.msra.mxu1 %v3121_v54 }
 0xfb1   : > { %2808 = vmatprep.subr.bf16.mxu1 %v3122_v55 }
 0xfb4   : > { %2809 = vmatpush3.bf16.msra.mxu1 %v3123_v56 }
0x1027   : > { %v2105_v17 = vpop.xlane.xlu0 %2104 }
0x1028   : > { %v2106_v18 = vmul.f32 0.015625, %v2105_v17 }
0x102a   : > { %v2107_v19 = vsub.f32 %v3624_v14, %v2106_v18 }
0x102c   : > { %v2108_v20 = vmul.f32 %v2107_v19, %v2107_v19 }
0x102e   : > { %v2109_v21 = vsel %vm440_vm0, %v2108_v20, 0.0  ;;  %v2691_v20 = vld [vmem:[%s3737_s12] ss:$0 sm:$0xff] }
0x102f   : > { %2110 = vadd.xlane.f32.xlu1 %v2109_v21 }
0x10b8   : > { %v2111_v35 = vpop.xlane.xlu1 %2110 }
0x10b9   : > { %v2112_v36 = vmul.f32 0.015625, %v2111_v35 }
0x10bb   : > { %v2113_v37 = vadd.f32 1e-06, %v2112_v36 }
0x10bd   : > { %3142 = vrsqrt.f32 %v2113_v37 }
0x10ca   : > { %v3143_v26 = vpop.eup %3142 }
0x10cb   : > { %v2115_v39 = vmul.f32 %v3143_v26, %v2107_v19 }
0x10cd   : > { %v2122_v41 = vmul.f32 %v2680_v38, %v2115_v39 }
0x10cf   : > { %v2129_v42 = vadd.f32 %v2681_v40, %v2122_v41 }
0x10d1   : > { %v2130_v13 = vpack.c.bf16 %v2129_v42, %v2129_v42 }
0x10d3   : > { %2690 = vmatmul.mubr.msk.bf16.vlgmr.msra.gmra.mxu0 %vm509_vm2, %v2130_v13 }
0x1193   : > { %v2228_v62 = vpop.f32.mrf.mxu0 }
0x1194   : > { %v2229_v63 = vadd.f32 %v2228_v62, %v2144_v8 }
0x1195   : > { %v2230_v0 = vpop.f32.mrf.mxu0 }
0x1196   : > { %v2237_v1 = vmul.f32 0.70710677, %v2229_v63  ;;  %v2231_v2 = vadd.f32 %v2230_v0, %v2148_v61  ;;  %v2235_v10 = vmul.f32 0.5, %v2229_v63 }
0x1197   : > { %v2232_v3 = vpop.f32.mrf.mxu0 }
0x1198   : > { %3144 = verf.f32 %v2237_v1  ;;  %v2238_v4 = vmul.f32 0.70710677, %v2231_v2  ;;  %v2236_v11 = vmul.f32 0.5, %v2231_v2 }
0x1199   : > { %v2233_v5 = vpop.f32.mrf.mxu0 }
0x119a   : > { %3146 = verf.f32 %v2238_v4 }
0x11a5   : > { %v3145_v6 = vpop.eup %3144 }
0x11a6   : > { %v2241_v7 = vadd.f32 1.0, %v3145_v6 }
0x11a7   : > { %v3147_v9 = vpop.eup %3146 }
0x11a8   : > { %v2242_v12 = vadd.f32 1.0, %v3147_v9  ;;  %v2243_v15 = vmul.f32 %v2241_v7, %v2235_v10 }
0x11aa   : > { %v2244_v16 = vmul.f32 %v2242_v12, %v2236_v11  ;;  %v2245_v18 = vpack.c.bf16 %v2243_v15, %v2243_v15 }
0x11ac   : > { %v2246_v17 = vpack.c.bf16 %v2244_v16, %v2244_v16 }
0x11ae   : > { %2414 = vmatprep.mubr.bf16.mxu1 %v2246_v17 }
0x11af   : > { %2415 = vmatmul.mubr.bf16.vlgmr.msra.gmra.mxu1 %v2245_v18 }
0x126f   : > { %v2810_v19 = vpop.f32.mrf.mxu1 }
0x1271   : > { %v2811_v21 = vpop.f32.mrf.mxu1 }
0x1272   : > { %v2812_v22 = vadd.f32 %v2811_v21, %v2810_v19 }
0x1273   : > { %v2813_v23 = vpop.f32.mrf.mxu1 }
0x1274   : > { %v2417_v24 = vadd.f32 %v2812_v22, %v2691_v20 }
0x1275   : > { %v2814_v25 = vpop.f32.mrf.mxu1 }
0x1276   : > { %v2422_v27 = vadd.f32 %v2417_v24, %v3624_v14 }
0x1278   : > { %2423 = vst.msk [vmem:[%s435_s30] sm:$0x1f] %vm440_vm0, %v2422_v27 }
0x1279 PF: > { %s23_s25 = sadd.s32 1, %s3155_s25  }
0x127a   : > { %p20_p4 = scmp.ge.s32.totalorder %s23_s25, 4  }
0x127c   :  { %22 = sbr.rel (!%p20_p4) target bundleno = 1 (0x1), region = 127 }

</bundles_post_ra>
